<compile_context>
chip_gen: v7x
topology: tpu7x:2x2x1
jax: 0.10.0
libtpu: 0.0.40
codegen_flags: <defaults>
</compile_context>

<pallas_src>
import numpy as np
import jax
import jax.numpy as jnp
from jax.experimental import pallas as pl
from jax.experimental.pallas import tpu as pltpu


PAD = 128          # per-branch lane width (all real feature widths <= 128)
W2 = 2 * PAD       # fused [bio | batch] slab width
B_PAD = 8          # sublane-padded batch (f32 sublane tile is 8)
N_OUT_SLABS = 5    # z | mu | logvar | preds | recon  (each 256-wide)


# ------------------------------ slot layout ----------------------------------

def _slot_layout(cfg):
    n_bio = len(cfg["bio_encoder_hidden_layers"])
    n_bat = len(cfg["batch_encoder_hidden_layers"])
    n_pc = len(cfg["batch_classifier_layers_power"])
    n_wc = len(cfg["batch_classifier_layers_weak"])
    n_dec = len(cfg["decoder_hidden_layers"])
    assert min(n_bio, n_bat, n_pc, n_wc, n_dec) >= 1
    L_enc, L_clf = max(n_bio, n_bat), max(n_pc, n_wc)
    slot_mu = L_enc
    slot_lv = L_enc + 1
    clf_start = L_enc + 2
    slot_clf_out = clf_start + L_clf
    dec_start = slot_clf_out + 1
    slot_dec_out = dec_start + n_dec
    return dict(L_enc=L_enc, L_clf=L_clf, n_dec=n_dec,
                slot_mu=slot_mu, slot_lv=slot_lv,
                clf_start=clf_start, slot_clf_out=slot_clf_out,
                dec_start=dec_start, slot_dec_out=slot_dec_out,
                n_slots=slot_dec_out + 1)


# ------------------------------ fused kernel ---------------------------------

def build_fused_kernel(cfg):
    lay = _slot_layout(cfg)

    def kernel(xe_ref, w_ref, b_ref, out_ref):
        xe = xe_ref[...]                 # (8, 512) f32
        x = xe[:, :W2]                   # [x | 0]   slab
        eps = xe[:, W2:]                 # [eps_bio | eps_bat] slab (padded lanes 0)

        def dense(h, i, relu=True):
            # bf16 x bf16 MXU matmul, f32 accumulation; bias add / ReLU in f32.
            y = jnp.dot(h.astype(jnp.bfloat16), w_ref[i],
                        preferred_element_type=jnp.float32)
            y = y + b_ref[i]
            return jnp.maximum(y, 0.0) if relu else y

        # --- fused encoders: one block-diag matmul per depth level -----------
        h = x
        for i in range(lay["L_enc"]):
            h = dense(h, i)              # h = [h_bio | h_bat]

        # --- merged mu / logvar heads (block-diag over both encoders) --------
        mu = dense(h, lay["slot_mu"], relu=False)    # [mu1 | mu2]
        lv = dense(h, lay["slot_lv"], relu=False)    # [lv1 | lv2]

        # --- fused reparameterize, f32 elementwise (eps padded lanes are 0) --
        z = mu + eps * jnp.exp(0.5 * lv)             # [bio_z | batch_z]

        # --- fused classifiers (GRL forward is identity) ----------------------
        c = z
        for j in range(lay["L_clf"]):
            c = dense(c, lay["clf_start"] + j)
        pred = dense(c, lay["slot_clf_out"], relu=False)   # [bio_pred | batch_pred]

        # --- decoder: z_combine without concat (split-row first slot) ---------
        d = z
        for t in range(lay["n_dec"]):
            d = dense(d, lay["dec_start"] + t)
        recon = dense(d, lay["slot_dec_out"], relu=False)  # [recon | 0]

        # --- single lane-dense output slab ------------------------------------
        out_ref[:, 0 * W2:1 * W2] = z
        out_ref[:, 1 * W2:2 * W2] = mu
        out_ref[:, 2 * W2:3 * W2] = lv
        out_ref[:, 3 * W2:4 * W2] = pred
        out_ref[:, 4 * W2:5 * W2] = recon

    return kernel, lay


# ------------------------- parameters (real shapes) --------------------------

def _init_linear(key, in_sz, out_sz):
    kw, kb = jax.random.split(key)
    w = jax.random.normal(kw, (in_sz, out_sz), jnp.float32) * 0.05
    b = jax.random.normal(kb, (out_sz,), jnp.float32) * 0.05
    return w, b


def _init_mlp(key, in_sz, hidden_layers, out_sz, n_heads=1):
    keys = jax.random.split(key, len(hidden_layers) + n_heads)
    hidden, prev = [], in_sz
    for i, h in enumerate(hidden_layers):
        hidden.append(_init_linear(keys[i], prev, h))
        prev = h
    heads = [_init_linear(keys[len(hidden_layers) + j], prev, out_sz)
             for j in range(n_heads)]
    return hidden, heads


def init_imcvae_params(key, cfg):
    k = jax.random.split(key, 5)
    bio_hidden, (bio_mu, bio_logvar) = _init_mlp(
        k[0], cfg["in_sz"], cfg["bio_encoder_hidden_layers"], cfg["latent_sz"], n_heads=2)
    bat_hidden, (bat_mu, bat_logvar) = _init_mlp(
        k[1], cfg["in_sz"], cfg["batch_encoder_hidden_layers"], cfg["latent_sz"], n_heads=2)
    dec_hidden, (dec_out,) = _init_mlp(
        k[2], 2 * cfg["latent_sz"], cfg["decoder_hidden_layers"], cfg["out_sz"])
    bio_clf_hidden, (bio_clf_out,) = _init_mlp(
        k[3], cfg["latent_sz"], cfg["batch_classifier_layers_power"], cfg["num_batch"])
    bat_clf_hidden, (bat_clf_out,) = _init_mlp(
        k[4], cfg["latent_sz"], cfg["batch_classifier_layers_weak"], cfg["num_batch"])
    return {
        "bio_enc": bio_hidden, "bio_mu": bio_mu, "bio_logvar": bio_logvar,
        "batch_enc": bat_hidden, "batch_mu": bat_mu, "batch_logvar": bat_logvar,
        "dec": dec_hidden, "dec_out": dec_out,
        "bio_clf": bio_clf_hidden, "bio_clf_out": bio_clf_out,
        "batch_clf": bat_clf_hidden, "batch_clf_out": bat_clf_out,
    }


# ------------- one-time packing into block-diagonal weight slots --------------

def _np(a):
    return np.asarray(a, dtype=np.float32)


def pack_params(params, cfg):
    """Pack all layers into (n_slots, 256, 256) bf16 weights + (n_slots, 8, 256)
    f32 pre-broadcast biases.  Done ONCE in numpy, outside the per-call path."""
    lay = _slot_layout(cfg)
    n_slots = lay["n_slots"]
    latent = cfg["latent_sz"]

    ws = np.zeros((n_slots, W2, W2), np.float32)
    bs = np.zeros((n_slots, W2), np.float32)

    def put(s, w, b, ro, co):
        w, b = _np(w), _np(b)
        ws[s, ro:ro + w.shape[0], co:co + w.shape[1]] = w
        bs[s, co:co + b.shape[0]] = b

    def put_eye(s, off):
        ws[s, off:off + PAD, off:off + PAD] = np.eye(PAD, dtype=np.float32)

    # ---- fused encoder stack (bio block | batch block) ----
    bio, bat = params["bio_enc"], params["batch_enc"]
    n_bio, n_bat = len(bio), len(bat)
    for i in range(lay["L_enc"]):
        if i < n_bio:
            put(i, bio[i][0], bio[i][1], 0, 0)
        else:
            put_eye(i, 0)
        if i < n_bat:
            # layer 0 reads x from the LEFT half of the slab -> rows start at 0.
            put(i, bat[i][0], bat[i][1], 0 if i == 0 else PAD, PAD)
        else:
            put_eye(i, PAD)

    # ---- merged mu / logvar heads ----
    put(lay["slot_mu"], params["bio_mu"][0], params["bio_mu"][1], 0, 0)
    put(lay["slot_mu"], params["batch_mu"][0], params["batch_mu"][1], PAD, PAD)
    put(lay["slot_lv"], params["bio_logvar"][0], params["bio_logvar"][1], 0, 0)
    put(lay["slot_lv"], params["batch_logvar"][0], params["batch_logvar"][1], PAD, PAD)

    # ---- fused classifiers (bio "power" block | batch "weak" block) ----
    pclf, wclf = params["bio_clf"], params["batch_clf"]
    n_pc, n_wc = len(pclf), len(wclf)
    for j in range(lay["L_clf"]):
        s = lay["clf_start"] + j
        if j < n_pc:
            put(s, pclf[j][0], pclf[j][1], 0, 0)
        else:
            put_eye(s, 0)
        if j < n_wc:
            put(s, wclf[j][0], wclf[j][1], PAD, PAD)
        else:
            put_eye(s, PAD)
    put(lay["slot_clf_out"], params["bio_clf_out"][0], params["bio_clf_out"][1], 0, 0)
    put(lay["slot_clf_out"], params["batch_clf_out"][0], params["batch_clf_out"][1], PAD, PAD)

    # ---- decoder: first layer reads the [bio_z | batch_z] slab (split rows) ----
    w0, b0 = _np(params["dec"][0][0]), _np(params["dec"][0][1])
    s0 = lay["dec_start"]
    ws[s0, 0:latent, 0:w0.shape[1]] = w0[:latent]
    ws[s0, PAD:PAD + latent, 0:w0.shape[1]] = w0[latent:]
    bs[s0, 0:b0.shape[0]] = b0
    for t, (w, b) in enumerate(params["dec"][1:]):
        put(s0 + 1 + t, w, b, 0, 0)
    put(lay["slot_dec_out"], params["dec_out"][0], params["dec_out"][1], 0, 0)

    w_stack = jnp.asarray(ws, dtype=jnp.bfloat16)
    b_stack = jnp.asarray(
        np.broadcast_to(bs[:, None, :], (n_slots, B_PAD, W2)).copy(), dtype=jnp.float32)
    return w_stack, b_stack


# --------------------------------- forward -----------------------------------

def make_imcvae_forward(cfg):
    kernel, lay = build_fused_kernel(cfg)
    n_slots = lay["n_slots"]
    latent, nb = cfg["latent_sz"], cfg["num_batch"]
    in_sz, out_sz = cfg["in_sz"], cfg["out_sz"]
    assert max([in_sz, out_sz, latent, nb]
               + cfg["bio_encoder_hidden_layers"] + cfg["batch_encoder_hidden_layers"]
               + cfg["decoder_hidden_layers"] + cfg["batch_classifier_layers_power"]
               + cfg["batch_classifier_layers_weak"]) <= PAD

    cost = pl.CostEstimate(
        flops=2 * B_PAD * W2 * W2 * n_slots,
        transcendentals=B_PAD * W2,
        bytes_accessed=(n_slots * W2 * W2 * 2            # bf16 weights
                        + n_slots * B_PAD * W2 * 4       # f32 biases
                        + B_PAD * 2 * W2 * 4             # x|eps
                        + B_PAD * N_OUT_SLABS * W2 * 4)) # output slab

    call = pl.pallas_call(
        kernel,
        out_shape=jax.ShapeDtypeStruct((B_PAD, N_OUT_SLABS * W2), jnp.float32),
        in_specs=[pl.BlockSpec(memory_space=pltpu.MemorySpace.VMEM)] * 3,
        out_specs=pl.BlockSpec(memory_space=pltpu.MemorySpace.VMEM),
        cost_estimate=cost,
    )

    def forward(w_stack, b_stack, x, eps):
        B = x.shape[0]
        assert B <= B_PAD
        # Packed activation input: [x slab | eps slab], padded latent lanes of
        # eps are zero -> padded lanes of z stay exactly zero (no in-kernel mask).
        xe = jnp.zeros((B_PAD, 2 * W2), jnp.float32)
        xe = xe.at[:B, :in_sz].set(x.astype(jnp.float32))
        xe = xe.at[:B, W2:W2 + latent].set(eps[:, :latent])
        xe = xe.at[:B, W2 + PAD:W2 + PAD + latent].set(eps[:, latent:])

        out = call(xe, w_stack, b_stack)

        def col(slab, half, d):
            c0 = slab * W2 + half * PAD
            return out[:B, c0:c0 + d]

        bio_z, batch_z = col(0, 0, latent), col(0, 1, latent)
        mu1, batch_mu = col(1, 0, latent), col(1, 1, latent)
        logvar1, batch_logvar = col(2, 0, latent), col(2, 1, latent)
        bio_pred, batch_pred = col(3, 0, nb), col(3, 1, nb)
        recon = col(4, 0, out_sz)
        return (bio_z, mu1, logvar1, batch_z, batch_mu, batch_logvar,
                bio_pred, batch_pred, recon)

    return jax.jit(forward)


# --------------------------- pure-JAX reference -------------------------------

def _ref_deterministic(params, x, bio_z, batch_z):
    """All eps-independent quantities with unpadded f32 weights (HIGHEST prec)."""
    dot = lambda a, w: jnp.dot(a, w, precision=jax.lax.Precision.HIGHEST)

    def mlp(h, layers):
        for w, b in layers:
            h = jnp.maximum(dot(h, w) + b, 0.0)
        return h

    h_bio = mlp(x, params["bio_enc"])
    mu1 = dot(h_bio, params["bio_mu"][0]) + params["bio_mu"][1]
    logvar1 = dot(h_bio, params["bio_logvar"][0]) + params["bio_logvar"][1]
    h_bat = mlp(x, params["batch_enc"])
    mu2 = dot(h_bat, params["batch_mu"][0]) + params["batch_mu"][1]
    logvar2 = dot(h_bat, params["batch_logvar"][0]) + params["batch_logvar"][1]
    bio_pred = dot(mlp(bio_z, params["bio_clf"]),
                   params["bio_clf_out"][0]) + params["bio_clf_out"][1]
    bat_pred = dot(mlp(batch_z, params["batch_clf"]),
                   params["batch_clf_out"][0]) + params["batch_clf_out"][1]
    hd = mlp(jnp.concatenate([bio_z, batch_z], axis=1), params["dec"])
    recon = dot(hd, params["dec_out"][0]) + params["dec_out"][1]
    return mu1, logvar1, mu2, logvar2, bio_pred, bat_pred, recon


# ----------------------------------- main -------------------------------------

if __name__ == "__main__":
    cfg = dict(
        in_sz=16,
        out_sz=16,
        latent_sz=8,
        num_batch=4,
        bio_encoder_hidden_layers=[32, 32],
        batch_encoder_hidden_layers=[32],
        decoder_hidden_layers=[32],
        batch_classifier_layers_power=[32, 16],
        batch_classifier_layers_weak=[16],
    )

    key = jax.random.PRNGKey(0)
    k_param, k_data, k_eps = jax.random.split(key, 3)

    params = init_imcvae_params(k_param, cfg)
    x = jax.random.normal(k_data, (2, cfg["in_sz"]), jnp.float32)        # (batch=2, 16)
    # exact N(0,1) noise (torch.randn_like): [bio eps | batch eps]
    eps = jax.random.normal(k_eps, (2, 2 * cfg["latent_sz"]), jnp.float32)

    # One-time packing + kernel build (hoisted out of the per-call path).
    w_stack, b_stack = pack_params(params, cfg)
    fwd = make_imcvae_forward(cfg)

    outs = jax.block_until_ready(fwd(w_stack, b_stack, x, eps))
    (bio_z, mu1, logvar1, batch_z, batch_mu, batch_logvar,
     bio_batch_pred, batch_batch_pred, reconstruction) = outs

    L, NB = cfg["latent_sz"], cfg["num_batch"]
    assert bio_z.shape == (2, L) and mu1.shape == (2, L) and logvar1.shape == (2, L)
    assert batch_z.shape == (2, L) and batch_mu.shape == (2, L) and batch_logvar.shape == (2, L)
    assert bio_batch_pred.shape == (2, NB) and batch_batch_pred.shape == (2, NB)
    assert reconstruction.shape == (2, cfg["out_sz"])
    assert all(bool(jnp.all(jnp.isfinite(o))) for o in outs)

    # reparameterize consistency (kernel's z vs its own mu/logvar, f32 math)
    assert jnp.allclose(bio_z, mu1 + eps[:, :L] * jnp.exp(0.5 * logvar1),
                        atol=1e-4, rtol=1e-4)
    assert jnp.allclose(batch_z, batch_mu + eps[:, L:] * jnp.exp(0.5 * batch_logvar),
                        atol=1e-4, rtol=1e-4)

    # numerics: every eps-independent quantity vs a pure-JAX f32 reference
    # (kernel matmuls run bf16 on the MXU -> slightly looser tolerance).
    r_mu1, r_lv1, r_mu2, r_lv2, r_bp, r_wp, r_rec = _ref_deterministic(
        params, x, bio_z, batch_z)
    for name, got, ref in (("mu1", mu1, r_mu1), ("logvar1", logvar1, r_lv1),
                           ("batch_mu", batch_mu, r_mu2),
                           ("batch_logvar", batch_logvar, r_lv2),
                           ("bio_batch_pred", bio_batch_pred, r_bp),
                           ("batch_batch_pred", batch_batch_pred, r_wp),
                           ("reconstruction", reconstruction, r_rec)):
        assert jnp.allclose(got, ref, atol=5e-3, rtol=3e-2), name

    print("KERNEL_OK")
</pallas_src>

<mosaic_0001>
module attributes {stable_mosaic.version = 11 : i64} {
  func.func @kernel(%arg0: memref<8x512xf32, #tpu.memory_space<vmem>>, %arg1: memref<9x256x256xbf16, #tpu.memory_space<vmem>>, %arg2: memref<9x8x256xf32, #tpu.memory_space<vmem>>, %arg3: memref<8x1280xf32, #tpu.memory_space<vmem>>) attributes {dimension_semantics = [], scalar_prefetch = 0 : i64, scratch_operands = 0 : i64, tpu.core_type = #tpu.core_type<tc>} {
    %c0 = arith.constant 0 : index
    %c0_0 = arith.constant 0 : index
    %0 = vector.load %arg0[%c0, %c0_0] : memref<8x512xf32, #tpu.memory_space<vmem>>, vector<8x512xf32>
    %1 = vector.extract_strided_slice %0 {offsets = [0, 0], sizes = [8, 256], strides = [1, 1]} : vector<8x512xf32> to vector<8x256xf32>
    %2 = vector.extract_strided_slice %0 {offsets = [0, 256], sizes = [8, 256], strides = [1, 1]} : vector<8x512xf32> to vector<8x256xf32>
    %3 = arith.truncf %1 : vector<8x256xf32> to vector<8x256xbf16>
    %c0_1 = arith.constant 0 : index
    %c0_2 = arith.constant 0 : index
    %c0_3 = arith.constant 0 : index
    %4 = vector.load %arg1[%c0_1, %c0_2, %c0_3] : memref<9x256x256xbf16, #tpu.memory_space<vmem>>, vector<1x256x256xbf16>
    %5 = vector.shape_cast %4 : vector<1x256x256xbf16> to vector<256x256xbf16>
    %cst = arith.constant dense<0.000000e+00> : vector<8x256xf32>
    %6 = tpu.matmul %3, %5, %cst {dimension_numbers = #tpu.dot_dimension_numbers<[1], [0], [0], [1], [0, 0, 1, 1], [], []>} : vector<8x256xbf16>, vector<256x256xbf16>, vector<8x256xf32> -> vector<8x256xf32>
    %c0_4 = arith.constant 0 : index
    %c0_5 = arith.constant 0 : index
    %c0_6 = arith.constant 0 : index
    %7 = vector.load %arg2[%c0_4, %c0_5, %c0_6] : memref<9x8x256xf32, #tpu.memory_space<vmem>>, vector<1x8x256xf32>
    %8 = vector.shape_cast %7 : vector<1x8x256xf32> to vector<8x256xf32>
    %9 = arith.addf %6, %8 : vector<8x256xf32>
    %cst_7 = arith.constant 0.000000e+00 : f32
    %10 = vector.broadcast %cst_7 : f32 to vector<8x256xf32>
    %11 = arith.maximumf %9, %10 : vector<8x256xf32>
    %12 = arith.truncf %11 : vector<8x256xf32> to vector<8x256xbf16>
    %c1 = arith.constant 1 : index
    %c0_8 = arith.constant 0 : index
    %c0_9 = arith.constant 0 : index
    %13 = vector.load %arg1[%c1, %c0_8, %c0_9] : memref<9x256x256xbf16, #tpu.memory_space<vmem>>, vector<1x256x256xbf16>
    %14 = vector.shape_cast %13 : vector<1x256x256xbf16> to vector<256x256xbf16>
    %cst_10 = arith.constant dense<0.000000e+00> : vector<8x256xf32>
    %15 = tpu.matmul %12, %14, %cst_10 {dimension_numbers = #tpu.dot_dimension_numbers<[1], [0], [0], [1], [0, 0, 1, 1], [], []>} : vector<8x256xbf16>, vector<256x256xbf16>, vector<8x256xf32> -> vector<8x256xf32>
    %c1_11 = arith.constant 1 : index
    %c0_12 = arith.constant 0 : index
    %c0_13 = arith.constant 0 : index
    %16 = vector.load %arg2[%c1_11, %c0_12, %c0_13] : memref<9x8x256xf32, #tpu.memory_space<vmem>>, vector<1x8x256xf32>
    %17 = vector.shape_cast %16 : vector<1x8x256xf32> to vector<8x256xf32>
    %18 = arith.addf %15, %17 : vector<8x256xf32>
    %cst_14 = arith.constant 0.000000e+00 : f32
    %19 = vector.broadcast %cst_14 : f32 to vector<8x256xf32>
    %20 = arith.maximumf %18, %19 : vector<8x256xf32>
    %21 = arith.truncf %20 : vector<8x256xf32> to vector<8x256xbf16>
    %c2 = arith.constant 2 : index
    %c0_15 = arith.constant 0 : index
    %c0_16 = arith.constant 0 : index
    %22 = vector.load %arg1[%c2, %c0_15, %c0_16] : memref<9x256x256xbf16, #tpu.memory_space<vmem>>, vector<1x256x256xbf16>
    %23 = vector.shape_cast %22 : vector<1x256x256xbf16> to vector<256x256xbf16>
    %cst_17 = arith.constant dense<0.000000e+00> : vector<8x256xf32>
    %24 = tpu.matmul %21, %23, %cst_17 {dimension_numbers = #tpu.dot_dimension_numbers<[1], [0], [0], [1], [0, 0, 1, 1], [], []>} : vector<8x256xbf16>, vector<256x256xbf16>, vector<8x256xf32> -> vector<8x256xf32>
    %c2_18 = arith.constant 2 : index
    %c0_19 = arith.constant 0 : index
    %c0_20 = arith.constant 0 : index
    %25 = vector.load %arg2[%c2_18, %c0_19, %c0_20] : memref<9x8x256xf32, #tpu.memory_space<vmem>>, vector<1x8x256xf32>
    %26 = vector.shape_cast %25 : vector<1x8x256xf32> to vector<8x256xf32>
    %27 = arith.addf %24, %26 : vector<8x256xf32>
    %28 = arith.truncf %20 : vector<8x256xf32> to vector<8x256xbf16>
    %c3 = arith.constant 3 : index
    %c0_21 = arith.constant 0 : index
    %c0_22 = arith.constant 0 : index
    %29 = vector.load %arg1[%c3, %c0_21, %c0_22] : memref<9x256x256xbf16, #tpu.memory_space<vmem>>, vector<1x256x256xbf16>
    %30 = vector.shape_cast %29 : vector<1x256x256xbf16> to vector<256x256xbf16>
    %cst_23 = arith.constant dense<0.000000e+00> : vector<8x256xf32>
    %31 = tpu.matmul %28, %30, %cst_23 {dimension_numbers = #tpu.dot_dimension_numbers<[1], [0], [0], [1], [0, 0, 1, 1], [], []>} : vector<8x256xbf16>, vector<256x256xbf16>, vector<8x256xf32> -> vector<8x256xf32>
    %c3_24 = arith.constant 3 : index
    %c0_25 = arith.constant 0 : index
    %c0_26 = arith.constant 0 : index
    %32 = vector.load %arg2[%c3_24, %c0_25, %c0_26] : memref<9x8x256xf32, #tpu.memory_space<vmem>>, vector<1x8x256xf32>
    %33 = vector.shape_cast %32 : vector<1x8x256xf32> to vector<8x256xf32>
    %34 = arith.addf %31, %33 : vector<8x256xf32>
    %cst_27 = arith.constant 5.000000e-01 : f32
    %35 = vector.broadcast %cst_27 : f32 to vector<8x256xf32>
    %36 = arith.mulf %35, %34 : vector<8x256xf32>
    %37 = math.exp %36 : vector<8x256xf32>
    %38 = arith.mulf %2, %37 : vector<8x256xf32>
    %39 = arith.addf %27, %38 : vector<8x256xf32>
    %40 = arith.truncf %39 : vector<8x256xf32> to vector<8x256xbf16>
    %c4 = arith.constant 4 : index
    %c0_28 = arith.constant 0 : index
    %c0_29 = arith.constant 0 : index
    %41 = vector.load %arg1[%c4, %c0_28, %c0_29] : memref<9x256x256xbf16, #tpu.memory_space<vmem>>, vector<1x256x256xbf16>
    %42 = vector.shape_cast %41 : vector<1x256x256xbf16> to vector<256x256xbf16>
    %cst_30 = arith.constant dense<0.000000e+00> : vector<8x256xf32>
    %43 = tpu.matmul %40, %42, %cst_30 {dimension_numbers = #tpu.dot_dimension_numbers<[1], [0], [0], [1], [0, 0, 1, 1], [], []>} : vector<8x256xbf16>, vector<256x256xbf16>, vector<8x256xf32> -> vector<8x256xf32>
    %c4_31 = arith.constant 4 : index
    %c0_32 = arith.constant 0 : index
    %c0_33 = arith.constant 0 : index
    %44 = vector.load %arg2[%c4_31, %c0_32, %c0_33] : memref<9x8x256xf32, #tpu.memory_space<vmem>>, vector<1x8x256xf32>
    %45 = vector.shape_cast %44 : vector<1x8x256xf32> to vector<8x256xf32>
    %46 = arith.addf %43, %45 : vector<8x256xf32>
    %cst_34 = arith.constant 0.000000e+00 : f32
    %47 = vector.broadcast %cst_34 : f32 to vector<8x256xf32>
    %48 = arith.maximumf %46, %47 : vector<8x256xf32>
    %49 = arith.truncf %48 : vector<8x256xf32> to vector<8x256xbf16>
    %c5 = arith.constant 5 : index
    %c0_35 = arith.constant 0 : index
    %c0_36 = arith.constant 0 : index
    %50 = vector.load %arg1[%c5, %c0_35, %c0_36] : memref<9x256x256xbf16, #tpu.memory_space<vmem>>, vector<1x256x256xbf16>
    %51 = vector.shape_cast %50 : vector<1x256x256xbf16> to vector<256x256xbf16>
    %cst_37 = arith.constant dense<0.000000e+00> : vector<8x256xf32>
    %52 = tpu.matmul %49, %51, %cst_37 {dimension_numbers = #tpu.dot_dimension_numbers<[1], [0], [0], [1], [0, 0, 1, 1], [], []>} : vector<8x256xbf16>, vector<256x256xbf16>, vector<8x256xf32> -> vector<8x256xf32>
    %c5_38 = arith.constant 5 : index
    %c0_39 = arith.constant 0 : index
    %c0_40 = arith.constant 0 : index
    %53 = vector.load %arg2[%c5_38, %c0_39, %c0_40] : memref<9x8x256xf32, #tpu.memory_space<vmem>>, vector<1x8x256xf32>
    %54 = vector.shape_cast %53 : vector<1x8x256xf32> to vector<8x256xf32>
    %55 = arith.addf %52, %54 : vector<8x256xf32>
    %cst_41 = arith.constant 0.000000e+00 : f32
    %56 = vector.broadcast %cst_41 : f32 to vector<8x256xf32>
    %57 = arith.maximumf %55, %56 : vector<8x256xf32>
    %58 = arith.truncf %57 : vector<8x256xf32> to vector<8x256xbf16>
    %c6 = arith.constant 6 : index
    %c0_42 = arith.constant 0 : index
    %c0_43 = arith.constant 0 : index
    %59 = vector.load %arg1[%c6, %c0_42, %c0_43] : memref<9x256x256xbf16, #tpu.memory_space<vmem>>, vector<1x256x256xbf16>
    %60 = vector.shape_cast %59 : vector<1x256x256xbf16> to vector<256x256xbf16>
    %cst_44 = arith.constant dense<0.000000e+00> : vector<8x256xf32>
    %61 = tpu.matmul %58, %60, %cst_44 {dimension_numbers = #tpu.dot_dimension_numbers<[1], [0], [0], [1], [0, 0, 1, 1], [], []>} : vector<8x256xbf16>, vector<256x256xbf16>, vector<8x256xf32> -> vector<8x256xf32>
    %c6_45 = arith.constant 6 : index
    %c0_46 = arith.constant 0 : index
    %c0_47 = arith.constant 0 : index
    %62 = vector.load %arg2[%c6_45, %c0_46, %c0_47] : memref<9x8x256xf32, #tpu.memory_space<vmem>>, vector<1x8x256xf32>
    %63 = vector.shape_cast %62 : vector<1x8x256xf32> to vector<8x256xf32>
    %64 = arith.addf %61, %63 : vector<8x256xf32>
    %65 = arith.truncf %39 : vector<8x256xf32> to vector<8x256xbf16>
    %c7 = arith.constant 7 : index
    %c0_48 = arith.constant 0 : index
    %c0_49 = arith.constant 0 : index
    %66 = vector.load %arg1[%c7, %c0_48, %c0_49] : memref<9x256x256xbf16, #tpu.memory_space<vmem>>, vector<1x256x256xbf16>
    %67 = vector.shape_cast %66 : vector<1x256x256xbf16> to vector<256x256xbf16>
    %cst_50 = arith.constant dense<0.000000e+00> : vector<8x256xf32>
    %68 = tpu.matmul %65, %67, %cst_50 {dimension_numbers = #tpu.dot_dimension_numbers<[1], [0], [0], [1], [0, 0, 1, 1], [], []>} : vector<8x256xbf16>, vector<256x256xbf16>, vector<8x256xf32> -> vector<8x256xf32>
    %c7_51 = arith.constant 7 : index
    %c0_52 = arith.constant 0 : index
    %c0_53 = arith.constant 0 : index
    %69 = vector.load %arg2[%c7_51, %c0_52, %c0_53] : memref<9x8x256xf32, #tpu.memory_space<vmem>>, vector<1x8x256xf32>
    %70 = vector.shape_cast %69 : vector<1x8x256xf32> to vector<8x256xf32>
    %71 = arith.addf %68, %70 : vector<8x256xf32>
    %cst_54 = arith.constant 0.000000e+00 : f32
    %72 = vector.broadcast %cst_54 : f32 to vector<8x256xf32>
    %73 = arith.maximumf %71, %72 : vector<8x256xf32>
    %74 = arith.truncf %73 : vector<8x256xf32> to vector<8x256xbf16>
    %c8 = arith.constant 8 : index
    %c0_55 = arith.constant 0 : index
    %c0_56 = arith.constant 0 : index
    %75 = vector.load %arg1[%c8, %c0_55, %c0_56] : memref<9x256x256xbf16, #tpu.memory_space<vmem>>, vector<1x256x256xbf16>
    %76 = vector.shape_cast %75 : vector<1x256x256xbf16> to vector<256x256xbf16>
    %cst_57 = arith.constant dense<0.000000e+00> : vector<8x256xf32>
    %77 = tpu.matmul %74, %76, %cst_57 {dimension_numbers = #tpu.dot_dimension_numbers<[1], [0], [0], [1], [0, 0, 1, 1], [], []>} : vector<8x256xbf16>, vector<256x256xbf16>, vector<8x256xf32> -> vector<8x256xf32>
    %c8_58 = arith.constant 8 : index
    %c0_59 = arith.constant 0 : index
    %c0_60 = arith.constant 0 : index
    %78 = vector.load %arg2[%c8_58, %c0_59, %c0_60] : memref<9x8x256xf32, #tpu.memory_space<vmem>>, vector<1x8x256xf32>
    %79 = vector.shape_cast %78 : vector<1x8x256xf32> to vector<8x256xf32>
    %80 = arith.addf %77, %79 : vector<8x256xf32>
    %c0_61 = arith.constant 0 : index
    %c0_62 = arith.constant 0 : index
    %81 = vector.load %arg3[%c0_61, %c0_62] : memref<8x1280xf32, #tpu.memory_space<vmem>>, vector<8x256xf32>
    tpu.vector_store %arg3[%c0_61, %c0_62], %39 {strides = array<i32>} : memref<8x1280xf32, #tpu.memory_space<vmem>>, vector<8x256xf32>,
    %c0_63 = arith.constant 0 : index
    %c256 = arith.constant 256 : index
    %82 = vector.load %arg3[%c0_63, %c256] : memref<8x1280xf32, #tpu.memory_space<vmem>>, vector<8x256xf32>
    tpu.vector_store %arg3[%c0_63, %c256], %27 {strides = array<i32>} : memref<8x1280xf32, #tpu.memory_space<vmem>>, vector<8x256xf32>,
    %c0_64 = arith.constant 0 : index
    %c512 = arith.constant 512 : index
    %83 = vector.load %arg3[%c0_64, %c512] : memref<8x1280xf32, #tpu.memory_space<vmem>>, vector<8x256xf32>
    tpu.vector_store %arg3[%c0_64, %c512], %34 {strides = array<i32>} : memref<8x1280xf32, #tpu.memory_space<vmem>>, vector<8x256xf32>,
    %c0_65 = arith.constant 0 : index
    %c768 = arith.constant 768 : index
    %84 = vector.load %arg3[%c0_65, %c768] : memref<8x1280xf32, #tpu.memory_space<vmem>>, vector<8x256xf32>
    tpu.vector_store %arg3[%c0_65, %c768], %64 {strides = array<i32>} : memref<8x1280xf32, #tpu.memory_space<vmem>>, vector<8x256xf32>,
    %c0_66 = arith.constant 0 : index
    %c1024 = arith.constant 1024 : index
    %85 = vector.load %arg3[%c0_66, %c1024] : memref<8x1280xf32, #tpu.memory_space<vmem>>, vector<8x256xf32>
    tpu.vector_store %arg3[%c0_66, %c1024], %80 {strides = array<i32>} : memref<8x1280xf32, #tpu.memory_space<vmem>>, vector<8x256xf32>,
    return
  }
}

</mosaic_0001>

<bundles_post_ra>
// kernel: forward.1
= control target key start
LH: loop header
LB: loop body
LE: loop exit
PB: predicated region body
PF: predicated region fallthrough
CT: control target
= control target key end

     0   :  { %8 = vsyncpa [#allocation3], 0  ;;  %s3105_s0 = inlined_call_operand.vmem [shape: f32[8,512], index: 0, kind: input, shape index: {}]   ;;  %s3106_s1 = inlined_call_operand.hbm [shape: bf16[9,256,256], index: 1, kind: input, shape index: {}]   ;;  %s3107_s2 = inlined_call_operand.hbm [shape: f32[9,8,256], index: 2, kind: input, shape index: {}]   ;;  %s3108_s3 = inlined_call_operand.vmem [shape: f32[8,1280], index: 3, kind: output, shape index: {}]  }
   0x1   :  { %9 = vsyncpa [#allocation5], 0  ;;  %s3005_s12 = smov [#allocation2]   ;;  %s2957_s16 = scalar_lea.hbm %s3106_s1, 36864 }
   0x2   :  { %s17_s13 = sshll.u32 %s3005_s12, 4  ;;  %p2958_p0 = scmp.ne.s32.totalorder %s3106_s1, %s2957_s16  ;;  %s18_s13 = int_to_ptr.vmem [resolvable:$true] %s17_s13 }
   0x3   :  { %p2961_p1 = scmp.lt.u32.totalorder %s2957_s16, %s3106_s1 }
   0x5   :  { %p2963_p2 = pnand %p2961_p1, %p2958_p0 }
   0x7   :  { %2966 = shalt.err (!%p2963_p2)
}
   0x8   :  { %s2967_s21 = scalar_lea.vmem %s18_s13, 36864  ;;  %p2972_p4 = scmp.lt.s32.totalorder %s18_s13, %s18_s13 }
   0x9   :  { %p2968_p3 = scmp.ne.s32.totalorder %s18_s13, %s2967_s21  ;;  %p2973_p5 = scmp.lt.s32.totalorder %s2967_s21, %s2967_s21 }
   0xb   :  { %p2974_p6 = por %p2973_p5, %p2972_p4 }
   0xd   :  { %p2975_p7 = pnand %p2974_p6, %p2968_p3 }
   0xf   :  { %2978 = shalt.err (!%p2975_p7)
}
  0x10   :  { %s3006_s22 = smov 128   ;;  %s3007_s23 = smov 8  }
  0x11   :  { %23 = dma.hbm_to_vmem [thread:$0]  %s3106_s1, 36864, %s18_s13, [#allocation3], %s3006_s22, %s3006_s22, %s3007_s23  }
  0x12   :  { %s3008_s26 = smov [#allocation4]   ;;  %s2979_s30 = scalar_lea.hbm %s3107_s2, 2304 }
  0x13   :  { %s29_s27 = sshll.u32 %s3008_s26, 4  ;;  %p2980_p8 = scmp.ne.s32.totalorder %s3107_s2, %s2979_s30  ;;  %s30_s27 = int_to_ptr.vmem [resolvable:$true] %s29_s27 }
  0x14   :  { %p2983_p9 = scmp.lt.u32.totalorder %s2979_s30, %s3107_s2 }
  0x16   :  { %p2985_p10 = pnand %p2983_p9, %p2980_p8 }
  0x18   :  { %2988 = shalt.err (!%p2985_p10)
}
  0x19   :  { %s2989_s8 = scalar_lea.vmem %s30_s27, 2304  ;;  %p2994_p12 = scmp.lt.s32.totalorder %s30_s27, %s30_s27 }
  0x1a   :  { %p2990_p11 = scmp.ne.s32.totalorder %s30_s27, %s2989_s8  ;;  %p2995_p13 = scmp.lt.s32.totalorder %s2989_s8, %s2989_s8 }
  0x1c   :  { %p2996_p0 = por %p2995_p13, %p2994_p12 }
  0x1e   :  { %p2997_p1 = pnand %p2996_p0, %p2990_p11 }
  0x20   :  { %3000 = shalt.err (!%p2997_p1)
}
  0x21   :  { %s3009_s1 = smov 256   ;;  %s3010_s9 = smov 16  }
  0x22   :  { %35 = dma.hbm_to_vmem [thread:$0]  %s3107_s2, 2304, %s30_s27, [#allocation5], %s3009_s1, %s3009_s1, %s3010_s9  }
  0x23   :  { %3001 = dma.done.wait [#allocation3], 36864  }
  0x24   :  { %3002 = vsyncadd [#allocation3], 4294930432 }
  0x25   :  { %3003 = dma.done.wait [#allocation5], 2304  }
  0x26   :  { %3004 = vsyncadd [#allocation5], 4294964992  ;;  %v2521_v0 = vld [vmem:[#allocation2 + $0x4] ss:$8 sps:$4 sm:$0xff]   ;;  %v2523_v1 = vld [vmem:[#allocation2] ss:$8 sps:$4 sm:$0xff]  }
  0x27   :  { %242 = vmatprep.subr.bf16.mxu0 %v2521_v0  ;;  %v2524_v2 = vld [vmem:[#allocation2 + $0x14] ss:$8 sps:$4 sm:$0xff]   ;;  %v2526_v3 = vld [vmem:[#allocation2 + $0x10] ss:$8 sps:$4 sm:$0xff]   ;;  %v2527_v4 = vld [vmem:[#allocation2 + $0x24] ss:$8 sps:$4 sm:$0xff]  }
  0x28   :  { %243 = vmatpush1.bf16.msra.mxu0 %v2523_v1  ;;  %v2529_v5 = vld [vmem:[#allocation2 + $0x20] ss:$8 sps:$4 sm:$0xff]   ;;  %v2530_v6 = vld [vmem:[#allocation2 + $0x34] ss:$8 sps:$4 sm:$0xff]   ;;  %v2532_v7 = vld [vmem:[#allocation2 + $0x30] ss:$8 sps:$4 sm:$0xff]  }
  0x29   :  { %244 = vmatprep.subr.bf16.mxu0 %v2524_v2  ;;  %v2533_v8 = vld [vmem:[#allocation2 + $0x44] ss:$8 sps:$4 sm:$0xff]   ;;  %v2535_v9 = vld [vmem:[#allocation2 + $0x40] ss:$8 sps:$4 sm:$0xff]   ;;  %v2536_v10 = vld [vmem:[#allocation2 + $0x54] ss:$8 sps:$4 sm:$0xff]  }
  0x2a   :  { %v2538_v11 = vld [vmem:[#allocation2 + $0x50] ss:$8 sps:$4 sm:$0xff]   ;;  %v2539_v12 = vld [vmem:[#allocation2 + $0x64] ss:$8 sps:$4 sm:$0xff]   ;;  %v2541_v13 = vld [vmem:[#allocation2 + $0x60] ss:$8 sps:$4 sm:$0xff]  }
  0x2b   :  { %v43_v14 = vld [vmem:[%s3105_s0 + $0x8] sm:$0xff]  ;;  %v2542_v18 = vld [vmem:[#allocation2 + $0x74] ss:$8 sps:$4 sm:$0xff]   ;;  %v2544_v20 = vld [vmem:[#allocation2 + $0x70] ss:$8 sps:$4 sm:$0xff]  }
  0x2c   :  { %245 = vmatpush1.bf16.msra.mxu0 %v2526_v3  ;;  %v47_v15 = vpack.c.bf16 %v43_v14, %v43_v14  ;;  %v2569_v16 = vld [vmem:[#allocation2 + $0x104] ss:$8 sps:$4 sm:$0xff]   ;;  %v2571_v17 = vld [vmem:[#allocation2 + $0x100] ss:$8 sps:$4 sm:$0xff]   ;;  %v2572_v19 = vld [vmem:[#allocation2 + $0x114] ss:$8 sps:$4 sm:$0xff]  }
  0x2d   :  { %246 = vmatprep.subr.bf16.mxu0 %v2527_v4  ;;  %483 = vmatprep.subr.bf16.mxu1 %v2569_v16  ;;  %v2574_v21 = vld [vmem:[#allocation2 + $0x110] ss:$8 sps:$4 sm:$0xff]   ;;  %v2575_v22 = vld [vmem:[#allocation2 + $0x124] ss:$8 sps:$4 sm:$0xff]   ;;  %v2547_v24 = vld [vmem:[#allocation2 + $0x80] ss:$8 sps:$4 sm:$0xff]  }
  0x2e   :  { %274 = vmatprep.mubr.bf16.mxu0 %v47_v15  ;;  %484 = vmatpush1.bf16.msra.mxu1 %v2571_v17  ;;  %v2545_v23 = vld [vmem:[#allocation2 + $0x84] ss:$8 sps:$4 sm:$0xff]   ;;  %v2577_v25 = vld [vmem:[#allocation2 + $0x120] ss:$8 sps:$4 sm:$0xff]   ;;  %v2578_v26 = vld [vmem:[#allocation2 + $0x134] ss:$8 sps:$4 sm:$0xff]  }
  0x2f   :  { %485 = vmatprep.subr.bf16.mxu1 %v2572_v19  ;;  %v2548_v27 = vld [vmem:[#allocation2 + $0x94] ss:$8 sps:$4 sm:$0xff]   ;;  %v2550_v28 = vld [vmem:[#allocation2 + $0x90] ss:$8 sps:$4 sm:$0xff]   ;;  %v2581_v30 = vld [vmem:[#allocation2 + $0x144] ss:$8 sps:$4 sm:$0xff]  }
  0x30   :  { %247 = vmatpush1.bf16.msra.mxu0 %v2529_v5  ;;  %v2580_v29 = vld [vmem:[#allocation2 + $0x130] ss:$8 sps:$4 sm:$0xff]   ;;  %v2551_v31 = vld [vmem:[#allocation2 + $0xa4] ss:$8 sps:$4 sm:$0xff]   ;;  %v2553_v32 = vld [vmem:[#allocation2 + $0xa0] ss:$8 sps:$4 sm:$0xff]  }
  0x31   :  { %248 = vmatprep.subr.bf16.mxu0 %v2530_v6  ;;  %v2583_v33 = vld [vmem:[#allocation2 + $0x140] ss:$8 sps:$4 sm:$0xff]   ;;  %v2584_v34 = vld [vmem:[#allocation2 + $0x154] ss:$8 sps:$4 sm:$0xff]   ;;  %v2586_v36 = vld [vmem:[#allocation2 + $0x150] ss:$8 sps:$4 sm:$0xff]  }
  0x32   :  { %486 = vmatpush1.bf16.msra.mxu1 %v2574_v21  ;;  %v2554_v35 = vld [vmem:[#allocation2 + $0xb4] ss:$8 sps:$4 sm:$0xff]   ;;  %v2556_v37 = vld [vmem:[#allocation2 + $0xb0] ss:$8 sps:$4 sm:$0xff]   ;;  %v2587_v38 = vld [vmem:[#allocation2 + $0x164] ss:$8 sps:$4 sm:$0xff]  }
  0x33   :  { %487 = vmatprep.subr.bf16.mxu1 %v2575_v22  ;;  %v2557_v39 = vld [vmem:[#allocation2 + $0xc4] ss:$8 sps:$4 sm:$0xff]   ;;  %v2589_v40 = vld [vmem:[#allocation2 + $0x160] ss:$8 sps:$4 sm:$0xff]   ;;  %v2590_v42 = vld [vmem:[#allocation2 + $0x174] ss:$8 sps:$4 sm:$0xff]  }
  0x34   :  { %249 = vmatpush1.bf16.msra.mxu0 %v2532_v7  ;;  %v2559_v41 = vld [vmem:[#allocation2 + $0xc0] ss:$8 sps:$4 sm:$0xff]   ;;  %v2560_v43 = vld [vmem:[#allocation2 + $0xd4] ss:$8 sps:$4 sm:$0xff]   ;;  %v2592_v44 = vld [vmem:[#allocation2 + $0x170] ss:$8 sps:$4 sm:$0xff]  }
  0x35   :  { %250 = vmatprep.subr.bf16.mxu0 %v2533_v8  ;;  %v2562_v45 = vld [vmem:[#allocation2 + $0xd0] ss:$8 sps:$4 sm:$0xff]   ;;  %v2593_v46 = vld [vmem:[#allocation2 + $0x184] ss:$8 sps:$4 sm:$0xff]   ;;  %v2595_v48 = vld [vmem:[#allocation2 + $0x180] ss:$8 sps:$4 sm:$0xff]  }
  0x36   :  { %488 = vmatpush1.bf16.msra.mxu1 %v2577_v25  ;;  %v2563_v47 = vld [vmem:[#allocation2 + $0xe4] ss:$8 sps:$4 sm:$0xff]   ;;  %v2565_v49 = vld [vmem:[#allocation2 + $0xe0] ss:$8 sps:$4 sm:$0xff]   ;;  %v2596_v50 = vld [vmem:[#allocation2 + $0x194] ss:$8 sps:$4 sm:$0xff]  }
  0x37   :  { %489 = vmatprep.subr.bf16.mxu1 %v2578_v26  ;;  %v2566_v51 = vld [vmem:[#allocation2 + $0xf4] ss:$8 sps:$4 sm:$0xff]   ;;  %v2598_v52 = vld [vmem:[#allocation2 + $0x190] ss:$8 sps:$4 sm:$0xff]   ;;  %v42_v54 = vld [vmem:[%s3105_s0] sm:$0xff] }
  0x38   :  { %251 = vmatpush1.bf16.msra.mxu0 %v2535_v9  ;;  %v2568_v53 = vld [vmem:[#allocation2 + $0xf0] ss:$8 sps:$4 sm:$0xff]   ;;  %v2599_v55 = vld [vmem:[#allocation2 + $0x1a4] ss:$8 sps:$4 sm:$0xff]   ;;  %v2601_v56 = vld [vmem:[#allocation2 + $0x1a0] ss:$8 sps:$4 sm:$0xff]   ;;  %v46_v58 = vpack.c.bf16 %v42_v54, %v42_v54 }
  0x39   :  { %252 = vmatprep.subr.bf16.mxu0 %v2536_v10  ;;  %v2602_v57 = vld [vmem:[#allocation2 + $0x1b4] ss:$8 sps:$4 sm:$0xff]   ;;  %v2604_v59 = vld [vmem:[#allocation2 + $0x1b0] ss:$8 sps:$4 sm:$0xff]   ;;  %v2605_v60 = vld [vmem:[#allocation2 + $0x1c4] ss:$8 sps:$4 sm:$0xff]  }
  0x3a   :  { %490 = vmatpush1.bf16.msra.mxu1 %v2580_v29  ;;  %v2607_v61 = vld [vmem:[#allocation2 + $0x1c0] ss:$8 sps:$4 sm:$0xff]   ;;  %v2608_v62 = vld [vmem:[#allocation2 + $0x1d4] ss:$8 sps:$4 sm:$0xff]   ;;  %v2610_v63 = vld [vmem:[#allocation2 + $0x1d0] ss:$8 sps:$4 sm:$0xff]  }
  0x3b   :  { %491 = vmatprep.subr.bf16.mxu1 %v2581_v30  ;;  %v2611_v0 = vld [vmem:[#allocation2 + $0x1e4] ss:$8 sps:$4 sm:$0xff]   ;;  %v2613_v1 = vld [vmem:[#allocation2 + $0x1e0] ss:$8 sps:$4 sm:$0xff]   ;;  %v2614_v2 = vld [vmem:[#allocation2 + $0x1f4] ss:$8 sps:$4 sm:$0xff]  }
  0x3c   :  { %253 = vmatpush1.bf16.msra.mxu0 %v2538_v11  ;;  %v2616_v3 = vld [vmem:[#allocation2 + $0x1f0] ss:$8 sps:$4 sm:$0xff]   ;;  %v2617_v4 = vld [vmem:[#allocation2 + $0x200] ss:$8 sps:$4 sm:$0xff]   ;;  %v2619_v5 = vld [vmem:[#allocation2 + $0x204] ss:$8 sps:$4 sm:$0xff]  }
  0x3d   :  { %254 = vmatprep.subr.bf16.mxu0 %v2539_v12  ;;  %v2622_v6 = vld [vmem:[#allocation2 + $0x304] ss:$8 sps:$4 sm:$0xff]   ;;  %v2625_v7 = vld [vmem:[#allocation2 + $0x214] ss:$8 sps:$4 sm:$0xff]   ;;  %v2623_v8 = vld [vmem:[#allocation2 + $0x210] ss:$8 sps:$4 sm:$0xff]  }
  0x3e   :  { %492 = vmatpush1.bf16.msra.mxu1 %v2583_v33  ;;  %v2631_v9 = vld [vmem:[#allocation2 + $0x224] ss:$8 sps:$4 sm:$0xff]   ;;  %v2629_v10 = vld [vmem:[#allocation2 + $0x220] ss:$8 sps:$4 sm:$0xff]   ;;  %v2637_v11 = vld [vmem:[#allocation2 + $0x234] ss:$8 sps:$4 sm:$0xff]  }
  0x3f   :  { %493 = vmatprep.subr.bf16.mxu1 %v2584_v34  ;;  %v2635_v12 = vld [vmem:[#allocation2 + $0x230] ss:$8 sps:$4 sm:$0xff]   ;;  %v2641_v14 = vld [vmem:[#allocation2 + $0x240] ss:$8 sps:$4 sm:$0xff]   ;;  %v2649_v15 = vld [vmem:[#allocation2 + $0x254] ss:$8 sps:$4 sm:$0xff]  }
  0x40   :  { %255 = vmatpush1.bf16.msra.mxu0 %v2541_v13  ;;  %v2643_v13 = vld [vmem:[#allocation2 + $0x244] ss:$8 sps:$4 sm:$0xff]   ;;  %v2647_v16 = vld [vmem:[#allocation2 + $0x250] ss:$8 sps:$4 sm:$0xff]   ;;  %v2661_v19 = vld [vmem:[#allocation2 + $0x274] ss:$8 sps:$4 sm:$0xff]  }
  0x41   :  { %256 = vmatprep.subr.bf16.mxu0 %v2542_v18  ;;  %v2655_v17 = vld [vmem:[#allocation2 + $0x264] ss:$8 sps:$4 sm:$0xff]   ;;  %v2653_v18 = vld [vmem:[#allocation2 + $0x260] ss:$8 sps:$4 sm:$0xff]   ;;  %v2652_v54 = vld [vmem:[#allocation2 + $0x354] ss:$8 sps:$4 sm:$0xff]  }
  0x42   :  { %494 = vmatpush1.bf16.msra.mxu1 %v2586_v36  ;;  %v2667_v21 = vld [vmem:[#allocation2 + $0x284] ss:$8 sps:$4 sm:$0xff]   ;;  %v2665_v22 = vld [vmem:[#allocation2 + $0x280] ss:$8 sps:$4 sm:$0xff]  }
  0x43   :  { %495 = vmatprep.subr.bf16.mxu1 %v2587_v38  ;;  %v2679_v25 = vld [vmem:[#allocation2 + $0x2a4] ss:$8 sps:$4 sm:$0xff]   ;;  %v2677_v26 = vld [vmem:[#allocation2 + $0x2a0] ss:$8 sps:$4 sm:$0xff]  }
  0x44   :  { %257 = vmatpush1.bf16.msra.mxu0 %v2544_v20  ;;  %v2659_v20 = vld [vmem:[#allocation2 + $0x270] ss:$8 sps:$4 sm:$0xff]   ;;  %v2691_v29 = vld [vmem:[#allocation2 + $0x2c4] ss:$8 sps:$4 sm:$0xff]   ;;  %v2689_v30 = vld [vmem:[#allocation2 + $0x2c0] ss:$8 sps:$4 sm:$0xff]  }
  0x45   :  { %258 = vmatprep.subr.bf16.mxu0 %v2545_v23  ;;  %v2673_v23 = vld [vmem:[#allocation2 + $0x294] ss:$8 sps:$4 sm:$0xff]   ;;  %v80_v33 = vld [vmem:[#allocation4] sm:$0xff]  ;;  %v81_v34 = vld [vmem:[#allocation4 + $0x8] sm:$0xff] }
  0x46   :  { %496 = vmatpush1.bf16.msra.mxu1 %v2589_v40 }
  0x47   :  { %497 = vmatprep.subr.bf16.mxu1 %v2590_v42 }
  0x48   :  { %259 = vmatpush1.bf16.msra.mxu0 %v2547_v24  ;;  %v2671_v24 = vld [vmem:[#allocation2 + $0x290] ss:$8 sps:$4 sm:$0xff]  }
  0x49   :  { %260 = vmatprep.subr.bf16.mxu0 %v2548_v27  ;;  %v2685_v27 = vld [vmem:[#allocation2 + $0x2b4] ss:$8 sps:$4 sm:$0xff]  }
  0x4a   :  { %498 = vmatpush1.bf16.msra.mxu1 %v2592_v44  ;;  %v2620_v44 = vld [vmem:[#allocation2 + $0x300] ss:$8 sps:$4 sm:$0xff]  }
  0x4b   :  { %499 = vmatprep.subr.bf16.mxu1 %v2593_v46  ;;  %v2628_v46 = vld [vmem:[#allocation2 + $0x314] ss:$8 sps:$4 sm:$0xff]  }
  0x4c   :  { %261 = vmatpush1.bf16.msra.mxu0 %v2550_v28  ;;  %v2683_v28 = vld [vmem:[#allocation2 + $0x2b0] ss:$8 sps:$4 sm:$0xff]  }
  0x4d   :  { %262 = vmatprep.subr.bf16.mxu0 %v2551_v31  ;;  %v2697_v31 = vld [vmem:[#allocation2 + $0x2d4] ss:$8 sps:$4 sm:$0xff]  }
  0x4e   :  { %500 = vmatpush1.bf16.msra.mxu1 %v2595_v48  ;;  %v2634_v48 = vld [vmem:[#allocation2 + $0x324] ss:$8 sps:$4 sm:$0xff]  }
  0x4f   :  { %501 = vmatprep.subr.bf16.mxu1 %v2596_v50  ;;  %v2640_v50 = vld [vmem:[#allocation2 + $0x334] ss:$8 sps:$4 sm:$0xff]  }
  0x50   :  { %263 = vmatpush1.bf16.msra.mxu0 %v2553_v32  ;;  %v2695_v32 = vld [vmem:[#allocation2 + $0x2d0] ss:$8 sps:$4 sm:$0xff]  }
  0x51   :  { %264 = vmatprep.subr.bf16.mxu0 %v2554_v35 }
  0x52   :  { %502 = vmatpush1.bf16.msra.mxu1 %v2598_v52  ;;  %v2646_v52 = vld [vmem:[#allocation2 + $0x344] ss:$8 sps:$4 sm:$0xff]  }
  0x53   :  { %503 = vmatprep.subr.bf16.mxu1 %v2599_v55  ;;  %v2650_v55 = vld [vmem:[#allocation2 + $0x350] ss:$8 sps:$4 sm:$0xff]  }
  0x54   :  { %265 = vmatpush1.bf16.msra.mxu0 %v2556_v37 }
  0x55   :  { %266 = vmatprep.subr.bf16.mxu0 %v2557_v39 }
  0x56   :  { %504 = vmatpush1.bf16.msra.mxu1 %v2601_v56  ;;  %v2658_v56 = vld [vmem:[#allocation2 + $0x364] ss:$8 sps:$4 sm:$0xff]  }
  0x57   :  { %505 = vmatprep.subr.bf16.mxu1 %v2602_v57  ;;  %v2656_v57 = vld [vmem:[#allocation2 + $0x360] ss:$8 sps:$4 sm:$0xff]  }
  0x58   :  { %267 = vmatpush1.bf16.msra.mxu0 %v2559_v41 }
  0x59   :  { %268 = vmatprep.subr.bf16.mxu0 %v2560_v43 }
  0x5a   :  { %506 = vmatpush1.bf16.msra.mxu1 %v2604_v59  ;;  %v2662_v59 = vld [vmem:[#allocation2 + $0x370] ss:$8 sps:$4 sm:$0xff]  }
  0x5b   :  { %507 = vmatprep.subr.bf16.mxu1 %v2605_v60  ;;  %v2670_v60 = vld [vmem:[#allocation2 + $0x384] ss:$8 sps:$4 sm:$0xff]  }
  0x5c   :  { %269 = vmatpush1.bf16.msra.mxu0 %v2562_v45 }
  0x5d   :  { %270 = vmatprep.subr.bf16.mxu0 %v2563_v47  ;;  %v2626_v47 = vld [vmem:[#allocation2 + $0x310] ss:$8 sps:$4 sm:$0xff]  }
  0x5e   :  { %508 = vmatpush1.bf16.msra.mxu1 %v2607_v61  ;;  %v2668_v61 = vld [vmem:[#allocation2 + $0x380] ss:$8 sps:$4 sm:$0xff]  }
  0x5f   :  { %509 = vmatprep.subr.bf16.mxu1 %v2608_v62  ;;  %v2676_v62 = vld [vmem:[#allocation2 + $0x394] ss:$8 sps:$4 sm:$0xff]  }
  0x60   :  { %271 = vmatpush1.bf16.msra.mxu0 %v2565_v49  ;;  %v2632_v49 = vld [vmem:[#allocation2 + $0x320] ss:$8 sps:$4 sm:$0xff]  }
  0x61   :  { %272 = vmatprep.subr.bf16.mxu0 %v2566_v51  ;;  %v2638_v51 = vld [vmem:[#allocation2 + $0x330] ss:$8 sps:$4 sm:$0xff]  }
  0x62   :  { %510 = vmatpush1.bf16.msra.mxu1 %v2610_v63  ;;  %v2674_v63 = vld [vmem:[#allocation2 + $0x390] ss:$8 sps:$4 sm:$0xff]  }
  0x63   :  { %511 = vmatprep.subr.bf16.mxu1 %v2611_v0  ;;  %v2682_v0 = vld [vmem:[#allocation2 + $0x3a4] ss:$8 sps:$4 sm:$0xff]  }
  0x64   :  { %273 = vmatpush1.bf16.msra.mxu0 %v2568_v53  ;;  %v2644_v53 = vld [vmem:[#allocation2 + $0x340] ss:$8 sps:$4 sm:$0xff]  }
  0x65   :  { %724 = vmatprep.subr.bf16.mxu0 %v2619_v5  ;;  %v2692_v5 = vld [vmem:[#allocation2 + $0x3c0] ss:$8 sps:$4 sm:$0xff]  }
  0x66   :  { %512 = vmatpush1.bf16.msra.mxu1 %v2613_v1  ;;  %v2680_v1 = vld [vmem:[#allocation2 + $0x3a0] ss:$8 sps:$4 sm:$0xff]  }
  0x67   :  { %275 = vmatmul.mubr.bf16.vlgmr.msra.gmra.mrb[0].mxu0 %v46_v58  ;;  %513 = vmatprep.subr.bf16.mxu1 %v2614_v2  ;;  %v2664_v58 = vld [vmem:[#allocation2 + $0x374] ss:$8 sps:$4 sm:$0xff]  }
  0x68   :  { %725 = vmatpush1.bf16.msra.mxu0 %v2617_v4  ;;  %v2688_v2 = vld [vmem:[#allocation2 + $0x3b4] ss:$8 sps:$4 sm:$0xff]   ;;  %v2694_v4 = vld [vmem:[#allocation2 + $0x3c4] ss:$8 sps:$4 sm:$0xff]  }
  0x69   :  { %726 = vmatprep.subr.bf16.mxu0 %v2625_v7  ;;  %v2698_v7 = vld [vmem:[#allocation2 + $0x3d0] ss:$8 sps:$4 sm:$0xff]  }
  0x6a   :  { %514 = vmatpush1.bf16.msra.mxu1 %v2616_v3  ;;  %v2686_v3 = vld [vmem:[#allocation2 + $0x3b0] ss:$8 sps:$4 sm:$0xff]  }
  0x6b   :  { %961 = vmatprep.subr.bf16.mxu1 %v2622_v6  ;;  %v2700_v6 = vld [vmem:[#allocation2 + $0x3d4] ss:$8 sps:$4 sm:$0xff]  }
  0x6c   :  { %727 = vmatpush1.bf16.msra.mxu0 %v2623_v8  ;;  %v2703_v8 = vld [vmem:[#allocation2 + $0x2e4] ss:$8 sps:$4 sm:$0xff]  }
  0x6d   :  { %728 = vmatprep.subr.bf16.mxu0 %v2631_v9  ;;  %v2706_v9 = vld [vmem:[#allocation2 + $0x3e4] ss:$8 sps:$4 sm:$0xff]  }
  0x70   :  { %729 = vmatpush1.bf16.msra.mxu0 %v2629_v10  ;;  %v2701_v10 = vld [vmem:[#allocation2 + $0x2e0] ss:$8 sps:$4 sm:$0xff]  }
  0x71   :  { %730 = vmatprep.subr.bf16.mxu0 %v2637_v11  ;;  %v2704_v11 = vld [vmem:[#allocation2 + $0x3e0] ss:$8 sps:$4 sm:$0xff]  }
  0x74   :  { %731 = vmatpush1.bf16.msra.mxu0 %v2635_v12  ;;  %v2709_v12 = vld [vmem:[#allocation2 + $0x2f4] ss:$8 sps:$4 sm:$0xff]  }
  0x75   :  { %732 = vmatprep.subr.bf16.mxu0 %v2643_v13  ;;  %v2712_v13 = vld [vmem:[#allocation2 + $0x3f4] ss:$8 sps:$4 sm:$0xff]  }
  0x78   :  { %733 = vmatpush1.bf16.msra.mxu0 %v2641_v14  ;;  %v2707_v14 = vld [vmem:[#allocation2 + $0x2f0] ss:$8 sps:$4 sm:$0xff]  }
  0x79   :  { %734 = vmatprep.subr.bf16.mxu0 %v2649_v15  ;;  %v2710_v15 = vld [vmem:[#allocation2 + $0x3f0] ss:$8 sps:$4 sm:$0xff]  }
  0x7c   :  { %735 = vmatpush1.bf16.msra.mxu0 %v2647_v16  ;;  %v2715_v16 = vld [vmem:[#allocation2 + $0x404] ss:$8 sps:$4 sm:$0xff]  }
  0x7d   :  { %736 = vmatprep.subr.bf16.mxu0 %v2655_v17  ;;  %v321_v17 = vld [vmem:[#allocation4 + $0x10] sm:$0xff] }
  0x80   :  { %737 = vmatpush1.bf16.msra.mxu0 %v2653_v18  ;;  %v322_v18 = vld [vmem:[#allocation4 + $0x18] sm:$0xff] }
  0x81   :  { %738 = vmatprep.subr.bf16.mxu0 %v2661_v19 }
  0x84   :  { %739 = vmatpush1.bf16.msra.mxu0 %v2659_v20 }
  0x85   :  { %740 = vmatprep.subr.bf16.mxu0 %v2667_v21 }
  0x88   :  { %741 = vmatpush1.bf16.msra.mxu0 %v2665_v22 }
  0x89   :  { %742 = vmatprep.subr.bf16.mxu0 %v2673_v23 }
  0x8c   :  { %743 = vmatpush1.bf16.msra.mxu0 %v2671_v24 }
  0x8d   :  { %744 = vmatprep.subr.bf16.mxu0 %v2679_v25 }
  0x90   :  { %745 = vmatpush1.bf16.msra.mxu0 %v2677_v26 }
  0x91   :  { %746 = vmatprep.subr.bf16.mxu0 %v2685_v27 }
  0x94   :  { %747 = vmatpush1.bf16.msra.mxu0 %v2683_v28  ;;  %v2713_v28 = vld [vmem:[#allocation2 + $0x400] ss:$8 sps:$4 sm:$0xff]  }
  0x95   :  { %748 = vmatprep.subr.bf16.mxu0 %v2691_v29 }
  0x98   :  { %749 = vmatpush1.bf16.msra.mxu0 %v2689_v30  ;;  %v2718_v30 = vld [vmem:[#allocation2 + $0x414] ss:$8 sps:$4 sm:$0xff]  }
  0x99   :  { %750 = vmatprep.subr.bf16.mxu0 %v2697_v31  ;;  %v2716_v31 = vld [vmem:[#allocation2 + $0x410] ss:$8 sps:$4 sm:$0xff]  }
  0x9c   :  { %751 = vmatpush1.bf16.msra.mxu0 %v2695_v32  ;;  %v2721_v32 = vld [vmem:[#allocation2 + $0x424] ss:$8 sps:$4 sm:$0xff]  }
  0x9d   :  { %752 = vmatprep.subr.bf16.mxu0 %v2703_v8  ;;  %v2781_v8 = vld [vmem:[#allocation2 + $0x564] ss:$8 sps:$4 sm:$0xff]  }
  0xa0   :  { %753 = vmatpush1.bf16.msra.mxu0 %v2701_v10  ;;  %v2784_v10 = vld [vmem:[#allocation2 + $0x574] ss:$8 sps:$4 sm:$0xff]  }
  0xa1   :  { %754 = vmatprep.subr.bf16.mxu0 %v2709_v12  ;;  %v2787_v12 = vld [vmem:[#allocation2 + $0x584] ss:$8 sps:$4 sm:$0xff]  }
  0xa4   :  { %755 = vmatpush1.bf16.msra.mxu0 %v2707_v14  ;;  %v2790_v14 = vld [vmem:[#allocation2 + $0x594] ss:$8 sps:$4 sm:$0xff]  }
  0xa5   :  { %1210 = vmatprep.subr.bf16.mxu0 %v2715_v16  ;;  %v2793_v16 = vld [vmem:[#allocation2 + $0x5a4] ss:$8 sps:$4 sm:$0xff]  }
 0x13a   :  { %v276_v35 = vpop.f32.mrb[0].mxu0 }
 0x13b   :  { %v277_v36 = vadd.f32 %v276_v35, %v80_v33  ;;  %v278_v37 = vpop.f32.mrb[1].mxu0  ;;  %v2719_v33 = vld [vmem:[#allocation2 + $0x420] ss:$8 sps:$4 sm:$0xff]   ;;  %v2722_v35 = vld [vmem:[#allocation2 + $0x430] ss:$8 sps:$4 sm:$0xff]  }
 0x13c   :  { %v279_v38 = vadd.f32 %v278_v37, %v81_v34  ;;  %v280_v39 = vpop.f32.mrb[2].mxu0  ;;  %v2724_v34 = vld [vmem:[#allocation2 + $0x434] ss:$8 sps:$4 sm:$0xff]   ;;  %v2725_v37 = vld [vmem:[#allocation2 + $0x440] ss:$8 sps:$4 sm:$0xff]  }
 0x13d   :  { %v283_v40 = vmax.f32 %v277_v36, 0.0  ;;  %v281_v41 = vpop.f32.mrb[3].mxu0  ;;  %v2727_v36 = vld [vmem:[#allocation2 + $0x444] ss:$8 sps:$4 sm:$0xff]   ;;  %v2728_v39 = vld [vmem:[#allocation2 + $0x450] ss:$8 sps:$4 sm:$0xff]  }
 0x13e   :  { %v284_v42 = vmax.f32 %v279_v38, 0.0  ;;  %v2730_v38 = vld [vmem:[#allocation2 + $0x454] ss:$8 sps:$4 sm:$0xff]   ;;  %v2731_v41 = vld [vmem:[#allocation2 + $0x460] ss:$8 sps:$4 sm:$0xff]  }
 0x13f   :  { %v285_v45 = vpack.c.bf16 %v283_v40, %v283_v40  ;;  %v2733_v40 = vld [vmem:[#allocation2 + $0x464] ss:$8 sps:$4 sm:$0xff]  }
 0x140   :  { %v286_v43 = vpack.c.bf16 %v284_v42, %v284_v42  ;;  %v2736_v42 = vld [vmem:[#allocation2 + $0x474] ss:$8 sps:$4 sm:$0xff]  }
 0x142   :  { %515 = vmatprep.mubr.bf16.mxu1 %v286_v43  ;;  %v2734_v43 = vld [vmem:[#allocation2 + $0x470] ss:$8 sps:$4 sm:$0xff]  }
 0x143   :  { %516 = vmatmul.mubr.bf16.vlgmr.msra.gmra.mrb[0].mxu1 %v285_v45  ;;  %v2737_v45 = vld [vmem:[#allocation2 + $0x480] ss:$8 sps:$4 sm:$0xff]  }
 0x144   :  { %962 = vmatpush1.bf16.msra.mxu1 %v2620_v44  ;;  %v2739_v44 = vld [vmem:[#allocation2 + $0x484] ss:$8 sps:$4 sm:$0xff]  }
 0x145   :  { %963 = vmatprep.subr.bf16.mxu1 %v2628_v46  ;;  %v2742_v46 = vld [vmem:[#allocation2 + $0x494] ss:$8 sps:$4 sm:$0xff]  }
 0x148   :  { %964 = vmatpush1.bf16.msra.mxu1 %v2626_v47  ;;  %v2740_v47 = vld [vmem:[#allocation2 + $0x490] ss:$8 sps:$4 sm:$0xff]  }
 0x149   :  { %965 = vmatprep.subr.bf16.mxu1 %v2634_v48  ;;  %v2745_v48 = vld [vmem:[#allocation2 + $0x4a4] ss:$8 sps:$4 sm:$0xff]  }
 0x14c   :  { %966 = vmatpush1.bf16.msra.mxu1 %v2632_v49  ;;  %v2743_v49 = vld [vmem:[#allocation2 + $0x4a0] ss:$8 sps:$4 sm:$0xff]  }
 0x14d   :  { %967 = vmatprep.subr.bf16.mxu1 %v2640_v50  ;;  %v2748_v50 = vld [vmem:[#allocation2 + $0x4b4] ss:$8 sps:$4 sm:$0xff]  }
 0x150   :  { %968 = vmatpush1.bf16.msra.mxu1 %v2638_v51  ;;  %v2746_v51 = vld [vmem:[#allocation2 + $0x4b0] ss:$8 sps:$4 sm:$0xff]  }
 0x151   :  { %969 = vmatprep.subr.bf16.mxu1 %v2646_v52  ;;  %v2749_v52 = vld [vmem:[#allocation2 + $0x4c0] ss:$8 sps:$4 sm:$0xff]  }
 0x154   :  { %970 = vmatpush1.bf16.msra.mxu1 %v2644_v53  ;;  %v2751_v53 = vld [vmem:[#allocation2 + $0x4c4] ss:$8 sps:$4 sm:$0xff]  }
 0x155   :  { %971 = vmatprep.subr.bf16.mxu1 %v2652_v54  ;;  %v2754_v54 = vld [vmem:[#allocation2 + $0x4d4] ss:$8 sps:$4 sm:$0xff]  }
 0x158   :  { %972 = vmatpush1.bf16.msra.mxu1 %v2650_v55  ;;  %v2752_v55 = vld [vmem:[#allocation2 + $0x4d0] ss:$8 sps:$4 sm:$0xff]  }
 0x159   :  { %973 = vmatprep.subr.bf16.mxu1 %v2658_v56  ;;  %v2757_v56 = vld [vmem:[#allocation2 + $0x4e4] ss:$8 sps:$4 sm:$0xff]  }
 0x15c   :  { %974 = vmatpush1.bf16.msra.mxu1 %v2656_v57  ;;  %v2755_v57 = vld [vmem:[#allocation2 + $0x4e0] ss:$8 sps:$4 sm:$0xff]  }
 0x15d   :  { %975 = vmatprep.subr.bf16.mxu1 %v2664_v58  ;;  %v2760_v58 = vld [vmem:[#allocation2 + $0x4f4] ss:$8 sps:$4 sm:$0xff]  }
 0x160   :  { %976 = vmatpush1.bf16.msra.mxu1 %v2662_v59  ;;  %v2758_v59 = vld [vmem:[#allocation2 + $0x4f0] ss:$8 sps:$4 sm:$0xff]  }
 0x161   :  { %977 = vmatprep.subr.bf16.mxu1 %v2670_v60  ;;  %v2761_v60 = vld [vmem:[#allocation2 + $0x500] ss:$8 sps:$4 sm:$0xff]  }
 0x164   :  { %978 = vmatpush1.bf16.msra.mxu1 %v2668_v61  ;;  %v2763_v61 = vld [vmem:[#allocation2 + $0x504] ss:$8 sps:$4 sm:$0xff]  }
 0x165   :  { %979 = vmatprep.subr.bf16.mxu1 %v2676_v62  ;;  %v2766_v62 = vld [vmem:[#allocation2 + $0x514] ss:$8 sps:$4 sm:$0xff]  }
 0x168   :  { %980 = vmatpush1.bf16.msra.mxu1 %v2674_v63  ;;  %v2764_v63 = vld [vmem:[#allocation2 + $0x510] ss:$8 sps:$4 sm:$0xff]  }
 0x169   :  { %981 = vmatprep.subr.bf16.mxu1 %v2682_v0  ;;  %v2769_v0 = vld [vmem:[#allocation2 + $0x524] ss:$8 sps:$4 sm:$0xff]  }
 0x16c   :  { %982 = vmatpush1.bf16.msra.mxu1 %v2680_v1  ;;  %v2767_v1 = vld [vmem:[#allocation2 + $0x520] ss:$8 sps:$4 sm:$0xff]  }
 0x16d   :  { %983 = vmatprep.subr.bf16.mxu1 %v2688_v2  ;;  %v2772_v2 = vld [vmem:[#allocation2 + $0x534] ss:$8 sps:$4 sm:$0xff]  }
 0x170   :  { %984 = vmatpush1.bf16.msra.mxu1 %v2686_v3  ;;  %v2770_v3 = vld [vmem:[#allocation2 + $0x530] ss:$8 sps:$4 sm:$0xff]  }
 0x171   :  { %985 = vmatprep.subr.bf16.mxu1 %v2694_v4  ;;  %v2775_v4 = vld [vmem:[#allocation2 + $0x544] ss:$8 sps:$4 sm:$0xff]  }
 0x174   :  { %986 = vmatpush1.bf16.msra.mxu1 %v2692_v5  ;;  %v2773_v5 = vld [vmem:[#allocation2 + $0x540] ss:$8 sps:$4 sm:$0xff]  }
 0x175   :  { %987 = vmatprep.subr.bf16.mxu1 %v2700_v6  ;;  %v2778_v6 = vld [vmem:[#allocation2 + $0x554] ss:$8 sps:$4 sm:$0xff]  }
 0x178   :  { %988 = vmatpush1.bf16.msra.mxu1 %v2698_v7  ;;  %v2776_v7 = vld [vmem:[#allocation2 + $0x550] ss:$8 sps:$4 sm:$0xff]  }
 0x179   :  { %989 = vmatprep.subr.bf16.mxu1 %v2706_v9  ;;  %v2779_v9 = vld [vmem:[#allocation2 + $0x560] ss:$8 sps:$4 sm:$0xff]  }
 0x17c   :  { %990 = vmatpush1.bf16.msra.mxu1 %v2704_v11  ;;  %v2782_v11 = vld [vmem:[#allocation2 + $0x570] ss:$8 sps:$4 sm:$0xff]  }
 0x17d   :  { %991 = vmatprep.subr.bf16.mxu1 %v2712_v13  ;;  %v2785_v13 = vld [vmem:[#allocation2 + $0x580] ss:$8 sps:$4 sm:$0xff]  }
 0x180   :  { %992 = vmatpush1.bf16.msra.mxu1 %v2710_v15  ;;  %v2788_v15 = vld [vmem:[#allocation2 + $0x590] ss:$8 sps:$4 sm:$0xff]  }
 0x181   :  { %1451 = vmatprep.subr.bf16.mxu1 %v2763_v61  ;;  %v2862_v61 = vld [vmem:[#allocation2 + $0x614] ss:$8 sps:$4 sm:$0xff]  }
 0x216   :  { %v517_v19 = vpop.f32.mrb[0].mxu1 }
 0x217   :  { %v518_v20 = vadd.f32 %v517_v19, %v321_v17  ;;  %v519_v21 = vpop.f32.mrb[1].mxu1  ;;  %v2791_v17 = vld [vmem:[#allocation2 + $0x5a0] ss:$8 sps:$4 sm:$0xff]   ;;  %v2794_v19 = vld [vmem:[#allocation2 + $0x5b0] ss:$8 sps:$4 sm:$0xff]  }
 0x218   :  { %v520_v22 = vadd.f32 %v519_v21, %v322_v18  ;;  %v521_v23 = vpop.f32.mrb[2].mxu1  ;;  %v2796_v18 = vld [vmem:[#allocation2 + $0x5b4] ss:$8 sps:$4 sm:$0xff]   ;;  %v2797_v21 = vld [vmem:[#allocation2 + $0x5c0] ss:$8 sps:$4 sm:$0xff]  }
 0x219   :  { %v524_v24 = vmax.f32 %v518_v20, 0.0  ;;  %v522_v25 = vpop.f32.mrb[3].mxu1  ;;  %v2799_v20 = vld [vmem:[#allocation2 + $0x5c4] ss:$8 sps:$4 sm:$0xff]   ;;  %v2800_v23 = vld [vmem:[#allocation2 + $0x5d0] ss:$8 sps:$4 sm:$0xff]  }
 0x21a   :  { %v525_v26 = vmax.f32 %v520_v22, 0.0  ;;  %v2802_v22 = vld [vmem:[#allocation2 + $0x5d4] ss:$8 sps:$4 sm:$0xff]  }
 0x21b   :  { %v526_v29 = vpack.c.bf16 %v524_v24, %v524_v24  ;;  %v562_v24 = vld [vmem:[#allocation4 + $0x20] sm:$0xff]  ;;  %v799_v25 = vld [vmem:[#allocation4 + $0x30] sm:$0xff] }
 0x21c   :  { %v527_v27 = vpack.c.bf16 %v525_v26, %v525_v26  ;;  %v563_v26 = vld [vmem:[#allocation4 + $0x28] sm:$0xff] }
 0x21e   :  { %756 = vmatprep.mubr.bf16.mxu0 %v527_v27  ;;  %993 = vmatprep.mubr.bf16.mxu1 %v527_v27  ;;  %v800_v27 = vld [vmem:[#allocation4 + $0x38] sm:$0xff] }
 0x21f   :  { %757 = vmatmul.mubr.bf16.vlgmr.msra.gmra.mrb[4].mxu0 %v526_v29  ;;  %994 = vmatmul.mubr.bf16.vlgmr.msra.gmra.mrb[4].mxu1 %v526_v29 }
 0x220   :  { %1211 = vmatpush1.bf16.msra.mxu0 %v2713_v28  ;;  %1452 = vmatpush1.bf16.msra.mxu1 %v2761_v60  ;;  %v2859_v60 = vld [vmem:[#allocation2 + $0x604] ss:$8 sps:$4 sm:$0xff]  }
 0x221   :  { %1212 = vmatprep.subr.bf16.mxu0 %v2718_v30  ;;  %1453 = vmatprep.subr.bf16.mxu1 %v2766_v62  ;;  %v2860_v62 = vld [vmem:[#allocation2 + $0x610] ss:$8 sps:$4 sm:$0xff]  }
 0x224   :  { %1213 = vmatpush1.bf16.msra.mxu0 %v2716_v31  ;;  %1454 = vmatpush1.bf16.msra.mxu1 %v2764_v63  ;;  %v2865_v63 = vld [vmem:[#allocation2 + $0x624] ss:$8 sps:$4 sm:$0xff]  }
 0x225   :  { %1214 = vmatprep.subr.bf16.mxu0 %v2721_v32  ;;  %1455 = vmatprep.subr.bf16.mxu1 %v2769_v0  ;;  %v2863_v0 = vld [vmem:[#allocation2 + $0x620] ss:$8 sps:$4 sm:$0xff]  }
 0x228   :  { %1215 = vmatpush1.bf16.msra.mxu0 %v2719_v33  ;;  %1456 = vmatpush1.bf16.msra.mxu1 %v2767_v1  ;;  %v2868_v1 = vld [vmem:[#allocation2 + $0x634] ss:$8 sps:$4 sm:$0xff]  }
 0x229   :  { %1216 = vmatprep.subr.bf16.mxu0 %v2724_v34  ;;  %1457 = vmatprep.subr.bf16.mxu1 %v2772_v2  ;;  %v2866_v2 = vld [vmem:[#allocation2 + $0x630] ss:$8 sps:$4 sm:$0xff]  }
 0x22c   :  { %1217 = vmatpush1.bf16.msra.mxu0 %v2722_v35  ;;  %1458 = vmatpush1.bf16.msra.mxu1 %v2770_v3  ;;  %v2871_v3 = vld [vmem:[#allocation2 + $0x644] ss:$8 sps:$4 sm:$0xff]  }
 0x22d   :  { %1218 = vmatprep.subr.bf16.mxu0 %v2727_v36  ;;  %1459 = vmatprep.subr.bf16.mxu1 %v2775_v4  ;;  %v2869_v4 = vld [vmem:[#allocation2 + $0x640] ss:$8 sps:$4 sm:$0xff]  }
 0x230   :  { %1219 = vmatpush1.bf16.msra.mxu0 %v2725_v37  ;;  %1460 = vmatpush1.bf16.msra.mxu1 %v2773_v5  ;;  %v2874_v5 = vld [vmem:[#allocation2 + $0x654] ss:$8 sps:$4 sm:$0xff]  }
 0x231   :  { %1220 = vmatprep.subr.bf16.mxu0 %v2730_v38  ;;  %1461 = vmatprep.subr.bf16.mxu1 %v2778_v6  ;;  %v2872_v6 = vld [vmem:[#allocation2 + $0x650] ss:$8 sps:$4 sm:$0xff]  }
 0x234   :  { %1221 = vmatpush1.bf16.msra.mxu0 %v2728_v39  ;;  %1462 = vmatpush1.bf16.msra.mxu1 %v2776_v7  ;;  %v2877_v7 = vld [vmem:[#allocation2 + $0x664] ss:$8 sps:$4 sm:$0xff]  }
 0x235   :  { %1222 = vmatprep.subr.bf16.mxu0 %v2733_v40  ;;  %1463 = vmatprep.subr.bf16.mxu1 %v2781_v8  ;;  %v2875_v8 = vld [vmem:[#allocation2 + $0x660] ss:$8 sps:$4 sm:$0xff]  }
 0x238   :  { %1223 = vmatpush1.bf16.msra.mxu0 %v2731_v41  ;;  %1464 = vmatpush1.bf16.msra.mxu1 %v2779_v9  ;;  %v2880_v9 = vld [vmem:[#allocation2 + $0x674] ss:$8 sps:$4 sm:$0xff]  }
 0x239   :  { %1224 = vmatprep.subr.bf16.mxu0 %v2736_v42  ;;  %1465 = vmatprep.subr.bf16.mxu1 %v2784_v10  ;;  %v2878_v10 = vld [vmem:[#allocation2 + $0x670] ss:$8 sps:$4 sm:$0xff]  }
 0x23c   :  { %1225 = vmatpush1.bf16.msra.mxu0 %v2734_v43  ;;  %1466 = vmatpush1.bf16.msra.mxu1 %v2782_v11  ;;  %v2883_v11 = vld [vmem:[#allocation2 + $0x684] ss:$8 sps:$4 sm:$0xff]  }
 0x23d   :  { %1226 = vmatprep.subr.bf16.mxu0 %v2739_v44  ;;  %1467 = vmatprep.subr.bf16.mxu1 %v2787_v12  ;;  %v44_v44 = vld [vmem:[%s3105_s0 + $0x10] sm:$0xff]  ;;  %v2881_v12 = vld [vmem:[#allocation2 + $0x680] ss:$8 sps:$4 sm:$0xff]  }
 0x240   :  { %1227 = vmatpush1.bf16.msra.mxu0 %v2737_v45  ;;  %1468 = vmatpush1.bf16.msra.mxu1 %v2785_v13  ;;  %v45_v45 = vld [vmem:[%s3105_s0 + $0x18] sm:$0xff] }
 0x241   :  { %1228 = vmatprep.subr.bf16.mxu0 %v2742_v46  ;;  %1469 = vmatprep.subr.bf16.mxu1 %v2790_v14  ;;  %v2886_v13 = vld [vmem:[#allocation2 + $0x694] ss:$8 sps:$4 sm:$0xff]   ;;  %v2884_v14 = vld [vmem:[#allocation2 + $0x690] ss:$8 sps:$4 sm:$0xff]  }
 0x244   :  { %1229 = vmatpush1.bf16.msra.mxu0 %v2740_v47  ;;  %1470 = vmatpush1.bf16.msra.mxu1 %v2788_v15  ;;  %v2889_v15 = vld [vmem:[#allocation2 + $0x6a4] ss:$8 sps:$4 sm:$0xff]  }
 0x245   :  { %1230 = vmatprep.subr.bf16.mxu0 %v2745_v48  ;;  %1471 = vmatprep.subr.bf16.mxu1 %v2793_v16  ;;  %v2887_v16 = vld [vmem:[#allocation2 + $0x6a0] ss:$8 sps:$4 sm:$0xff]  }
 0x248   :  { %1231 = vmatpush1.bf16.msra.mxu0 %v2743_v49  ;;  %1472 = vmatpush1.bf16.msra.mxu1 %v2791_v17  ;;  %v2892_v17 = vld [vmem:[#allocation2 + $0x6b4] ss:$8 sps:$4 sm:$0xff]  }
 0x249   :  { %1232 = vmatprep.subr.bf16.mxu0 %v2748_v50  ;;  %1473 = vmatprep.subr.bf16.mxu1 %v2796_v18  ;;  %v2890_v18 = vld [vmem:[#allocation2 + $0x6b0] ss:$8 sps:$4 sm:$0xff]  }
 0x24c   :  { %1233 = vmatpush1.bf16.msra.mxu0 %v2746_v51  ;;  %1474 = vmatpush1.bf16.msra.mxu1 %v2794_v19  ;;  %v2895_v19 = vld [vmem:[#allocation2 + $0x6c4] ss:$8 sps:$4 sm:$0xff]  }
 0x24d   :  { %1234 = vmatprep.subr.bf16.mxu0 %v2751_v53  ;;  %1475 = vmatprep.subr.bf16.mxu1 %v2799_v20  ;;  %v2893_v20 = vld [vmem:[#allocation2 + $0x6c0] ss:$8 sps:$4 sm:$0xff]  }
 0x250   :  { %1235 = vmatpush1.bf16.msra.mxu0 %v2749_v52  ;;  %1476 = vmatpush1.bf16.msra.mxu1 %v2797_v21  ;;  %v2898_v21 = vld [vmem:[#allocation2 + $0x6d4] ss:$8 sps:$4 sm:$0xff]  }
 0x251   :  { %1236 = vmatprep.subr.bf16.mxu0 %v2754_v54  ;;  %1477 = vmatprep.subr.bf16.mxu1 %v2802_v22  ;;  %v2805_v54 = vld [vmem:[#allocation2 + $0x5e4] ss:$8 sps:$4 sm:$0xff]   ;;  %v2896_v22 = vld [vmem:[#allocation2 + $0x6d0] ss:$8 sps:$4 sm:$0xff]  }
 0x254   :  { %1237 = vmatpush1.bf16.msra.mxu0 %v2752_v55  ;;  %1478 = vmatpush1.bf16.msra.mxu1 %v2800_v23  ;;  %v2803_v55 = vld [vmem:[#allocation2 + $0x5e0] ss:$8 sps:$4 sm:$0xff]  }
 0x255   :  { %1238 = vmatprep.subr.bf16.mxu0 %v2757_v56  ;;  %1479 = vmatprep.subr.bf16.mxu1 %v2805_v54  ;;  %v2808_v56 = vld [vmem:[#allocation2 + $0x5f4] ss:$8 sps:$4 sm:$0xff]   ;;  %v1048_v23 = vld [vmem:[#allocation4 + $0x40] sm:$0xff]  ;;  %v2836_v54 = vld [vmem:[#allocation2 + $0x790] ss:$8 sps:$4 sm:$0xff]  }
 0x258   :  { %1239 = vmatpush1.bf16.msra.mxu0 %v2755_v57  ;;  %1480 = vmatpush1.bf16.msra.mxu1 %v2803_v55  ;;  %v2806_v57 = vld [vmem:[#allocation2 + $0x5f0] ss:$8 sps:$4 sm:$0xff]   ;;  %v2841_v55 = vld [vmem:[#allocation2 + $0x7a4] ss:$8 sps:$4 sm:$0xff]  }
 0x259   :  { %1240 = vmatprep.subr.bf16.mxu0 %v2760_v58  ;;  %1481 = vmatprep.subr.bf16.mxu1 %v2808_v56  ;;  %v2811_v58 = vld [vmem:[#allocation2 + $0x704] ss:$8 sps:$4 sm:$0xff]   ;;  %v2839_v56 = vld [vmem:[#allocation2 + $0x7a0] ss:$8 sps:$4 sm:$0xff]  }
 0x25c   :  { %1241 = vmatpush1.bf16.msra.mxu0 %v2758_v59  ;;  %1482 = vmatpush1.bf16.msra.mxu1 %v2806_v57  ;;  %v2857_v59 = vld [vmem:[#allocation2 + $0x600] ss:$8 sps:$4 sm:$0xff]   ;;  %v2844_v57 = vld [vmem:[#allocation2 + $0x7b4] ss:$8 sps:$4 sm:$0xff]  }
 0x25d   :  { %1929 = vmatprep.subr.bf16.mxu1 %v2811_v58  ;;  %1692 = vmatprep.subr.bf16.mxu0 %v2859_v60  ;;  %v2842_v58 = vld [vmem:[#allocation2 + $0x7b0] ss:$8 sps:$4 sm:$0xff]   ;;  %v2845_v60 = vld [vmem:[#allocation2 + $0x7c0] ss:$8 sps:$4 sm:$0xff]  }
 0x2f2   :  { %v758_v28 = vpop.f32.mrb[4].mxu0  ;;  %v995_v29 = vpop.f32.mrb[4].mxu1 }
 0x2f3   :  { %v759_v30 = vadd.f32 %v758_v28, %v562_v24  ;;  %v996_v31 = vadd.f32 %v995_v29, %v799_v25  ;;  %v760_v32 = vpop.f32.mrb[5].mxu0  ;;  %v997_v33 = vpop.f32.mrb[5].mxu1  ;;  %v1049_v24 = vld [vmem:[#allocation4 + $0x48] sm:$0xff] }
 0x2f4   :  { %v761_v34 = vadd.f32 %v760_v32, %v563_v26  ;;  %v998_v35 = vadd.f32 %v997_v33, %v800_v27  ;;  %v762_v36 = vpop.f32.mrb[6].mxu0  ;;  %v999_v37 = vpop.f32.mrb[6].mxu1 }
 0x2f5   :  { %2213 = vst [vmem:[%s3108_s3 + $0x10] sm:$0xff] %v759_v30  ;;  %v1002_v38 = vmul.f32 0.5, %v996_v31  ;;  %2215 = vst [vmem:[%s3108_s3 + $0x20] sm:$0xff] %v996_v31  ;;  %v763_v39 = vpop.f32.mrb[7].mxu0  ;;  %v1000_v40 = vpop.f32.mrb[7].mxu1 }
 0x2f6   :  { %2214 = vst [vmem:[%s3108_s3 + $0x18] sm:$0xff] %v761_v34  ;;  %v1003_v41 = vmul.f32 0.5, %v998_v35  ;;  %2216 = vst [vmem:[%s3108_s3 + $0x28] sm:$0xff] %v998_v35  ;;  %v2814_v36 = vld [vmem:[#allocation2 + $0x714] ss:$8 sps:$4 sm:$0xff]  }
 0x2f7   :  { %v1004_v42 = vmul.f32 1.442695, %v1002_v38  ;;  %v2812_v37 = vld [vmem:[#allocation2 + $0x710] ss:$8 sps:$4 sm:$0xff]   ;;  %v2817_v38 = vld [vmem:[#allocation2 + $0x724] ss:$8 sps:$4 sm:$0xff]  }
 0x2f8   :  { %v1006_v43 = vmul.f32 1.442695, %v1003_v41  ;;  %v2815_v39 = vld [vmem:[#allocation2 + $0x720] ss:$8 sps:$4 sm:$0xff]   ;;  %v2820_v40 = vld [vmem:[#allocation2 + $0x734] ss:$8 sps:$4 sm:$0xff]  }
 0x2f9   :  { %2953 = vpow2.f32 %v1004_v42  ;;  %v2818_v41 = vld [vmem:[#allocation2 + $0x730] ss:$8 sps:$4 sm:$0xff]   ;;  %v2823_v42 = vld [vmem:[#allocation2 + $0x744] ss:$8 sps:$4 sm:$0xff]  }
 0x2fa   :  { %2955 = vpow2.f32 %v1006_v43  ;;  %v2821_v43 = vld [vmem:[#allocation2 + $0x740] ss:$8 sps:$4 sm:$0xff]  }
 0x303   :  { %v2954_v46 = vpop.eup %2953 }
 0x304   :  { %v2956_v47 = vpop.eup %2955  ;;  %v1008_v48 = vmul.f32 %v2954_v46, %v44_v44  ;;  %v2826_v44 = vld [vmem:[#allocation2 + $0x754] ss:$8 sps:$4 sm:$0xff]   ;;  %v2829_v46 = vld [vmem:[#allocation2 + $0x764] ss:$8 sps:$4 sm:$0xff]  }
 0x305   :  { %v1009_v49 = vmul.f32 %v2956_v47, %v45_v45  ;;  %v2824_v45 = vld [vmem:[#allocation2 + $0x750] ss:$8 sps:$4 sm:$0xff]   ;;  %v2827_v47 = vld [vmem:[#allocation2 + $0x760] ss:$8 sps:$4 sm:$0xff]  }
 0x306   :  { %v1010_v50 = vadd.f32 %v1008_v48, %v759_v30  ;;  %v2832_v48 = vld [vmem:[#allocation2 + $0x774] ss:$8 sps:$4 sm:$0xff]  }
 0x307   :  { %v1011_v51 = vadd.f32 %v1009_v49, %v761_v34  ;;  %v2809_v34 = vld [vmem:[#allocation2 + $0x700] ss:$8 sps:$4 sm:$0xff]   ;;  %v2830_v49 = vld [vmem:[#allocation2 + $0x770] ss:$8 sps:$4 sm:$0xff]  }
 0x308   :  { %2211 = vst [vmem:[%s3108_s3] sm:$0xff] %v1010_v50  ;;  %v3087_v53 = vpack.c.bf16 %v1010_v50, %v1010_v50  ;;  %v2835_v50 = vld [vmem:[#allocation2 + $0x784] ss:$8 sps:$4 sm:$0xff]  }
 0x309   :  { %v3082_v52 = vpack.c.bf16 %v1011_v51, %v1011_v51  ;;  %2212 = vst [vmem:[%s3108_s3 + $0x8] sm:$0xff] %v1011_v51  ;;  %v2833_v51 = vld [vmem:[#allocation2 + $0x780] ss:$8 sps:$4 sm:$0xff]  }
 0x30b   :  { %1242 = vmatprep.mubr.bf16.mxu0 %v3082_v52 }
 0x30c   :  { %1243 = vmatmul.mubr.bf16.vlgmr.msra.gmra.mrb[8].mxu0 %v3087_v53 }
 0x30d   :  { %1693 = vmatpush1.bf16.msra.mxu0 %v2857_v59  ;;  %v2847_v59 = vld [vmem:[#allocation2 + $0x7c4] ss:$8 sps:$4 sm:$0xff]  }
 0x30e   :  { %1694 = vmatprep.subr.bf16.mxu0 %v2862_v61  ;;  %v2850_v61 = vld [vmem:[#allocation2 + $0x7d4] ss:$8 sps:$4 sm:$0xff]  }
 0x311   :  { %1695 = vmatpush1.bf16.msra.mxu0 %v2860_v62  ;;  %v2848_v62 = vld [vmem:[#allocation2 + $0x7d0] ss:$8 sps:$4 sm:$0xff]  }
 0x312   :  { %1696 = vmatprep.subr.bf16.mxu0 %v2865_v63  ;;  %v2853_v63 = vld [vmem:[#allocation2 + $0x7e4] ss:$8 sps:$4 sm:$0xff]  }
 0x315   :  { %1697 = vmatpush1.bf16.msra.mxu0 %v2863_v0  ;;  %v2851_v0 = vld [vmem:[#allocation2 + $0x7e0] ss:$8 sps:$4 sm:$0xff]  }
 0x316   :  { %1698 = vmatprep.subr.bf16.mxu0 %v2868_v1  ;;  %v2856_v1 = vld [vmem:[#allocation2 + $0x7f4] ss:$8 sps:$4 sm:$0xff]  }
 0x319   :  { %1699 = vmatpush1.bf16.msra.mxu0 %v2866_v2  ;;  %v2854_v2 = vld [vmem:[#allocation2 + $0x7f0] ss:$8 sps:$4 sm:$0xff]  }
 0x31a   :  { %1700 = vmatprep.subr.bf16.mxu0 %v2871_v3  ;;  %v2901_v3 = vld [vmem:[#allocation2 + $0x6e4] ss:$8 sps:$4 sm:$0xff]  }
 0x31d   :  { %1701 = vmatpush1.bf16.msra.mxu0 %v2869_v4  ;;  %v2899_v4 = vld [vmem:[#allocation2 + $0x6e0] ss:$8 sps:$4 sm:$0xff]  }
 0x31e   :  { %1702 = vmatprep.subr.bf16.mxu0 %v2874_v5  ;;  %v2904_v5 = vld [vmem:[#allocation2 + $0x6f4] ss:$8 sps:$4 sm:$0xff]  }
 0x321   :  { %1703 = vmatpush1.bf16.msra.mxu0 %v2872_v6  ;;  %v2902_v6 = vld [vmem:[#allocation2 + $0x6f0] ss:$8 sps:$4 sm:$0xff]  }
 0x322   :  { %1704 = vmatprep.subr.bf16.mxu0 %v2877_v7  ;;  %v2907_v7 = vld [vmem:[#allocation2 + $0x804] ss:$8 sps:$4 sm:$0xff]  }
 0x325   :  { %1705 = vmatpush1.bf16.msra.mxu0 %v2875_v8  ;;  %v1289_v8 = vld [vmem:[#allocation4 + $0x50] sm:$0xff] }
 0x326   :  { %1706 = vmatprep.subr.bf16.mxu0 %v2880_v9  ;;  %v1290_v9 = vld [vmem:[#allocation4 + $0x58] sm:$0xff] }
 0x329   :  { %1707 = vmatpush1.bf16.msra.mxu0 %v2878_v10 }
 0x32a   :  { %1708 = vmatprep.subr.bf16.mxu0 %v2883_v11 }
 0x32d   :  { %1709 = vmatpush1.bf16.msra.mxu0 %v2881_v12 }
 0x32e   :  { %1710 = vmatprep.subr.bf16.mxu0 %v2886_v13 }
 0x331   :  { %1711 = vmatpush1.bf16.msra.mxu0 %v2884_v14 }
 0x332   :  { %1712 = vmatprep.subr.bf16.mxu0 %v2889_v15 }
 0x335   :  { %1713 = vmatpush1.bf16.msra.mxu0 %v2887_v16 }
 0x336   :  { %1714 = vmatprep.subr.bf16.mxu0 %v2892_v17 }
 0x339   :  { %1715 = vmatpush1.bf16.msra.mxu0 %v2890_v18  ;;  %v2905_v18 = vld [vmem:[#allocation2 + $0x800] ss:$8 sps:$4 sm:$0xff]  }
 0x33a   :  { %1716 = vmatprep.subr.bf16.mxu0 %v2895_v19 }
 0x33d   :  { %1717 = vmatpush1.bf16.msra.mxu0 %v2893_v20  ;;  %v2910_v20 = vld [vmem:[#allocation2 + $0x814] ss:$8 sps:$4 sm:$0xff]  }
 0x33e   :  { %1718 = vmatprep.subr.bf16.mxu0 %v2898_v21  ;;  %v2908_v21 = vld [vmem:[#allocation2 + $0x810] ss:$8 sps:$4 sm:$0xff]  }
 0x341   :  { %1719 = vmatpush1.bf16.msra.mxu0 %v2896_v22  ;;  %v2913_v22 = vld [vmem:[#allocation2 + $0x824] ss:$8 sps:$4 sm:$0xff]  }
 0x342   :  { %1720 = vmatprep.subr.bf16.mxu0 %v2901_v3 }
 0x345   :  { %1721 = vmatpush1.bf16.msra.mxu0 %v2899_v4 }
 0x346   :  { %1722 = vmatprep.subr.bf16.mxu0 %v2904_v5 }
 0x349   :  { %1723 = vmatpush1.bf16.msra.mxu0 %v2902_v6 }
 0x34a   :  { %2170 = vmatprep.subr.bf16.mxu0 %v2907_v7  ;;  %v2008_v7 = vld [vmem:[#allocation4 + $0x80] sm:$0xff] }
 0x3df   :  { %v1244_v25 = vpop.f32.mrb[8].mxu0 }
 0x3e0   :  { %v1245_v26 = vadd.f32 %v1244_v25, %v1048_v23  ;;  %v1246_v27 = vpop.f32.mrb[9].mxu0  ;;  %v2911_v23 = vld [vmem:[#allocation2 + $0x820] ss:$8 sps:$4 sm:$0xff]   ;;  %v2914_v25 = vld [vmem:[#allocation2 + $0x830] ss:$8 sps:$4 sm:$0xff]  }
 0x3e1   :  { %v1247_v28 = vadd.f32 %v1246_v27, %v1049_v24  ;;  %v1248_v29 = vpop.f32.mrb[10].mxu0  ;;  %v2916_v24 = vld [vmem:[#allocation2 + $0x834] ss:$8 sps:$4 sm:$0xff]   ;;  %v2917_v27 = vld [vmem:[#allocation2 + $0x840] ss:$8 sps:$4 sm:$0xff]  }
 0x3e2   :  { %v1251_v30 = vmax.f32 %v1245_v26, 0.0  ;;  %v1249_v31 = vpop.f32.mrb[11].mxu0  ;;  %v2919_v26 = vld [vmem:[#allocation2 + $0x844] ss:$8 sps:$4 sm:$0xff]   ;;  %v2920_v29 = vld [vmem:[#allocation2 + $0x850] ss:$8 sps:$4 sm:$0xff]  }
 0x3e3   :  { %v1252_v32 = vmax.f32 %v1247_v28, 0.0  ;;  %v2922_v28 = vld [vmem:[#allocation2 + $0x854] ss:$8 sps:$4 sm:$0xff]   ;;  %v2923_v31 = vld [vmem:[#allocation2 + $0x860] ss:$8 sps:$4 sm:$0xff]  }
 0x3e4   :  { %v1253_v35 = vpack.c.bf16 %v1251_v30, %v1251_v30  ;;  %v2925_v30 = vld [vmem:[#allocation2 + $0x864] ss:$8 sps:$4 sm:$0xff]  }
 0x3e5   :  { %v1254_v33 = vpack.c.bf16 %v1252_v32, %v1252_v32  ;;  %v2928_v32 = vld [vmem:[#allocation2 + $0x874] ss:$8 sps:$4 sm:$0xff]  }
 0x3e7   :  { %1483 = vmatprep.mubr.bf16.mxu1 %v1254_v33  ;;  %v2926_v33 = vld [vmem:[#allocation2 + $0x870] ss:$8 sps:$4 sm:$0xff]  }
 0x3e8   :  { %1484 = vmatmul.mubr.bf16.vlgmr.msra.gmra.mrb[8].mxu1 %v1253_v35  ;;  %v2929_v35 = vld [vmem:[#allocation2 + $0x880] ss:$8 sps:$4 sm:$0xff]  }
 0x3e9   :  { %1930 = vmatpush1.bf16.msra.mxu1 %v2809_v34  ;;  %1961 = vmatprep.mubr.bf16.mxu1 %v3082_v52  ;;  %v2838_v52 = vld [vmem:[#allocation2 + $0x794] ss:$8 sps:$4 sm:$0xff]   ;;  %v2931_v34 = vld [vmem:[#allocation2 + $0x884] ss:$8 sps:$4 sm:$0xff]  }
 0x3ea   :  { %1931 = vmatprep.subr.bf16.mxu1 %v2814_v36  ;;  %v2934_v36 = vld [vmem:[#allocation2 + $0x894] ss:$8 sps:$4 sm:$0xff]  }
 0x3ed   :  { %1932 = vmatpush1.bf16.msra.mxu1 %v2812_v37  ;;  %v2932_v37 = vld [vmem:[#allocation2 + $0x890] ss:$8 sps:$4 sm:$0xff]  }
 0x3ee   :  { %1933 = vmatprep.subr.bf16.mxu1 %v2817_v38  ;;  %v2937_v38 = vld [vmem:[#allocation2 + $0x8a4] ss:$8 sps:$4 sm:$0xff]  }
 0x3f1   :  { %1934 = vmatpush1.bf16.msra.mxu1 %v2815_v39  ;;  %v2935_v39 = vld [vmem:[#allocation2 + $0x8a0] ss:$8 sps:$4 sm:$0xff]  }
 0x3f2   :  { %1935 = vmatprep.subr.bf16.mxu1 %v2820_v40  ;;  %v2940_v40 = vld [vmem:[#allocation2 + $0x8b4] ss:$8 sps:$4 sm:$0xff]  }
 0x3f5   :  { %1936 = vmatpush1.bf16.msra.mxu1 %v2818_v41  ;;  %v2938_v41 = vld [vmem:[#allocation2 + $0x8b0] ss:$8 sps:$4 sm:$0xff]  }
 0x3f6   :  { %1937 = vmatprep.subr.bf16.mxu1 %v2823_v42  ;;  %v2943_v42 = vld [vmem:[#allocation2 + $0x8c4] ss:$8 sps:$4 sm:$0xff]  }
 0x3f9   :  { %1938 = vmatpush1.bf16.msra.mxu1 %v2821_v43  ;;  %v2941_v43 = vld [vmem:[#allocation2 + $0x8c0] ss:$8 sps:$4 sm:$0xff]  }
 0x3fa   :  { %1939 = vmatprep.subr.bf16.mxu1 %v2826_v44  ;;  %v2946_v44 = vld [vmem:[#allocation2 + $0x8d4] ss:$8 sps:$4 sm:$0xff]  }
 0x3fd   :  { %1940 = vmatpush1.bf16.msra.mxu1 %v2824_v45  ;;  %v2944_v45 = vld [vmem:[#allocation2 + $0x8d0] ss:$8 sps:$4 sm:$0xff]  }
 0x3fe   :  { %1941 = vmatprep.subr.bf16.mxu1 %v2829_v46  ;;  %v2949_v46 = vld [vmem:[#allocation2 + $0x8e4] ss:$8 sps:$4 sm:$0xff]  }
 0x401   :  { %1942 = vmatpush1.bf16.msra.mxu1 %v2827_v47  ;;  %v1767_v47 = vld [vmem:[#allocation4 + $0x70] sm:$0xff] }
 0x402   :  { %1943 = vmatprep.subr.bf16.mxu1 %v2832_v48  ;;  %v2947_v48 = vld [vmem:[#allocation2 + $0x8e0] ss:$8 sps:$4 sm:$0xff]  }
 0x405   :  { %1944 = vmatpush1.bf16.msra.mxu1 %v2830_v49  ;;  %v1768_v49 = vld [vmem:[#allocation4 + $0x78] sm:$0xff] }
 0x406   :  { %1945 = vmatprep.subr.bf16.mxu1 %v2835_v50  ;;  %v2952_v50 = vld [vmem:[#allocation2 + $0x8f4] ss:$8 sps:$4 sm:$0xff]  }
 0x409   :  { %1946 = vmatpush1.bf16.msra.mxu1 %v2833_v51 }
 0x40a   :  { %1947 = vmatprep.subr.bf16.mxu1 %v2838_v52 }
 0x40d   :  { %1948 = vmatpush1.bf16.msra.mxu1 %v2836_v54 }
 0x40e   :  { %1949 = vmatprep.subr.bf16.mxu1 %v2841_v55 }
 0x411   :  { %1950 = vmatpush1.bf16.msra.mxu1 %v2839_v56 }
 0x412   :  { %1951 = vmatprep.subr.bf16.mxu1 %v2844_v57  ;;  %v2950_v57 = vld [vmem:[#allocation2 + $0x8f0] ss:$8 sps:$4 sm:$0xff]  }
 0x415   :  { %1952 = vmatpush1.bf16.msra.mxu1 %v2842_v58 }
 0x416   :  { %1953 = vmatprep.subr.bf16.mxu1 %v2847_v59 }
 0x419   :  { %1954 = vmatpush1.bf16.msra.mxu1 %v2845_v60 }
 0x41a   :  { %1955 = vmatprep.subr.bf16.mxu1 %v2850_v61 }
 0x41d   :  { %1956 = vmatpush1.bf16.msra.mxu1 %v2848_v62 }
 0x41e   :  { %1957 = vmatprep.subr.bf16.mxu1 %v2853_v63  ;;  %v1530_v63 = vld [vmem:[#allocation4 + $0x60] sm:$0xff] }
 0x421   :  { %1958 = vmatpush1.bf16.msra.mxu1 %v2851_v0  ;;  %v1531_v0 = vld [vmem:[#allocation4 + $0x68] sm:$0xff] }
 0x422   :  { %1959 = vmatprep.subr.bf16.mxu1 %v2856_v1 }
 0x425   :  { %1960 = vmatpush1.bf16.msra.mxu1 %v2854_v2 }
 0x428   :  { %1962 = vmatmul.mubr.bf16.vlgmr.msra.gmra.mrb[12].mxu1 %v3087_v53 }
 0x4bb   :  { %v1485_v10 = vpop.f32.mrb[8].mxu1 }
 0x4bc   :  { %v1486_v11 = vadd.f32 %v1485_v10, %v1289_v8  ;;  %v1487_v12 = vpop.f32.mrb[9].mxu1  ;;  %v2009_v8 = vld [vmem:[#allocation4 + $0x88] sm:$0xff] }
 0x4bd   :  { %v1488_v13 = vadd.f32 %v1487_v12, %v1290_v9  ;;  %v1489_v14 = vpop.f32.mrb[10].mxu1 }
 0x4be   :  { %v1492_v15 = vmax.f32 %v1486_v11, 0.0  ;;  %v1490_v16 = vpop.f32.mrb[11].mxu1 }
 0x4bf   :  { %v1493_v53 = vmax.f32 %v1488_v13, 0.0 }
 0x4c0   :  { %v1494_v19 = vpack.c.bf16 %v1492_v15, %v1492_v15 }
 0x4c1   :  { %v1495_v17 = vpack.c.bf16 %v1493_v53, %v1493_v53 }
 0x4c3   :  { %1724 = vmatprep.mubr.bf16.mxu0 %v1495_v17 }
 0x4c4   :  { %1725 = vmatmul.mubr.bf16.vlgmr.msra.gmra.mrb[12].mxu0 %v1494_v19 }
 0x4c5   :  { %2171 = vmatpush1.bf16.msra.mxu0 %v2905_v18 }
 0x4c6   :  { %2172 = vmatprep.subr.bf16.mxu0 %v2910_v20 }
 0x4c9   :  { %2173 = vmatpush1.bf16.msra.mxu0 %v2908_v21 }
 0x4ca   :  { %2174 = vmatprep.subr.bf16.mxu0 %v2913_v22 }
 0x4cd   :  { %2175 = vmatpush1.bf16.msra.mxu0 %v2911_v23 }
 0x4ce   :  { %2176 = vmatprep.subr.bf16.mxu0 %v2916_v24 }
 0x4d1   :  { %2177 = vmatpush1.bf16.msra.mxu0 %v2914_v25 }
 0x4d2   :  { %2178 = vmatprep.subr.bf16.mxu0 %v2919_v26 }
 0x4d5   :  { %2179 = vmatpush1.bf16.msra.mxu0 %v2917_v27 }
 0x4d6   :  { %2180 = vmatprep.subr.bf16.mxu0 %v2922_v28 }
 0x4d9   :  { %2181 = vmatpush1.bf16.msra.mxu0 %v2920_v29 }
 0x4da   :  { %2182 = vmatprep.subr.bf16.mxu0 %v2925_v30 }
 0x4dd   :  { %2183 = vmatpush1.bf16.msra.mxu0 %v2923_v31 }
 0x4de   :  { %2184 = vmatprep.subr.bf16.mxu0 %v2928_v32 }
 0x4e1   :  { %2185 = vmatpush1.bf16.msra.mxu0 %v2926_v33 }
 0x4e2   :  { %2186 = vmatprep.subr.bf16.mxu0 %v2931_v34 }
 0x4e5   :  { %2187 = vmatpush1.bf16.msra.mxu0 %v2929_v35 }
 0x4e6   :  { %2188 = vmatprep.subr.bf16.mxu0 %v2934_v36 }
 0x4e9   :  { %2189 = vmatpush1.bf16.msra.mxu0 %v2932_v37 }
 0x4ea   :  { %2190 = vmatprep.subr.bf16.mxu0 %v2937_v38 }
 0x4ed   :  { %2191 = vmatpush1.bf16.msra.mxu0 %v2935_v39 }
 0x4ee   :  { %2192 = vmatprep.subr.bf16.mxu0 %v2940_v40 }
 0x4f1   :  { %2193 = vmatpush1.bf16.msra.mxu0 %v2938_v41 }
 0x4f2   :  { %2194 = vmatprep.subr.bf16.mxu0 %v2943_v42 }
 0x4f5   :  { %2195 = vmatpush1.bf16.msra.mxu0 %v2941_v43 }
 0x4f6   :  { %2196 = vmatprep.subr.bf16.mxu0 %v2946_v44 }
 0x4f9   :  { %2197 = vmatpush1.bf16.msra.mxu0 %v2944_v45 }
 0x4fa   :  { %2198 = vmatprep.subr.bf16.mxu0 %v2949_v46 }
 0x4fb   :  { %v1963_v51 = vpop.f32.mrb[12].mxu1 }
 0x4fc   :  { %v1964_v52 = vadd.f32 %v1963_v51, %v1767_v47  ;;  %v1965_v54 = vpop.f32.mrb[13].mxu1 }
 0x4fd   :  { %v1966_v55 = vadd.f32 %v1965_v54, %v1768_v49  ;;  %v1967_v56 = vpop.f32.mrb[14].mxu1  ;;  %2199 = vmatpush1.bf16.msra.mxu0 %v2947_v48 }
 0x4fe   :  { %v1970_v58 = vmax.f32 %v1964_v52, 0.0  ;;  %v1968_v59 = vpop.f32.mrb[15].mxu1  ;;  %2200 = vmatprep.subr.bf16.mxu0 %v2952_v50 }
 0x4ff   :  { %v1971_v60 = vmax.f32 %v1966_v55, 0.0 }
 0x500   :  { %v1972_v62 = vpack.c.bf16 %v1970_v58, %v1970_v58 }
 0x501   :  { %v1973_v61 = vpack.c.bf16 %v1971_v60, %v1971_v60  ;;  %2201 = vmatpush1.bf16.msra.mxu0 %v2950_v57 }
 0x503   :  { %2202 = vmatprep.mubr.bf16.mxu0 %v1973_v61 }
 0x504   :  { %2203 = vmatmul.mubr.bf16.vlgmr.msra.gmra.mrb[16].mxu0 %v1972_v62 }
 0x597   :  { %v1726_v1 = vpop.f32.mrb[12].mxu0 }
 0x598   :  { %v1727_v2 = vadd.f32 %v1726_v1, %v1530_v63  ;;  %v1728_v3 = vpop.f32.mrb[13].mxu0 }
 0x599   :  { %v1729_v4 = vadd.f32 %v1728_v3, %v1531_v0  ;;  %v1730_v5 = vpop.f32.mrb[14].mxu0 }
 0x59a   :  { %2217 = vst [vmem:[%s3108_s3 + $0x30] sm:$0xff] %v1727_v2  ;;  %v1731_v6 = vpop.f32.mrb[15].mxu0 }
 0x59b   :  { %2218 = vst [vmem:[%s3108_s3 + $0x38] sm:$0xff] %v1729_v4 }
 0x5d7   :  { %v2204_v9 = vpop.f32.mrb[16].mxu0 }
 0x5d8   :  { %v2205_v10 = vadd.f32 %v2204_v9, %v2008_v7  ;;  %v2206_v11 = vpop.f32.mrb[17].mxu0 }
 0x5d9   :  { %v2207_v12 = vadd.f32 %v2206_v11, %v2009_v8  ;;  %v2208_v13 = vpop.f32.mrb[18].mxu0 }
 0x5da   :  { %2219 = vst [vmem:[%s3108_s3 + $0x40] sm:$0xff] %v2205_v10  ;;  %v2209_v14 = vpop.f32.mrb[19].mxu0 }
 0x5db   :  { %2220 = vst [vmem:[%s3108_s3 + $0x48] sm:$0xff] %v2207_v12 }
 0x5dc   :  { %2225 = vsyncpa [#allocation3], 1 }
 0x5dd   :  { %2226 = vsyncpa [#allocation5], 1 }

</bundles_post_ra>
